<compile_context>
chip_gen: v5e
topology: v5e:2x2
jax: 0.10.0
libtpu: 0.0.40
codegen_flags: <defaults>
</compile_context>

<pallas_src>
import math
import functools

import numpy as np
import jax
import jax.numpy as jnp
from jax.experimental import pallas as pl
from jax.experimental.pallas import tpu as pltpu


# ---------------------------------------------------------------------------
# Exact GELU (erf-based, matching nn.GELU() default), f32 VPU math.
# ---------------------------------------------------------------------------
_ERF_ALPHA = (-2.72614225801306e-10, 2.77068142495902e-08, -2.10102402082508e-06,
              -5.69250639462346e-05, -7.34990630326855e-04, -2.95459980854025e-03,
              -1.60960333262415e-02)
_ERF_BETA = (-1.45660718464996e-05, -2.13374055278905e-04, -1.68282697438203e-03,
             -7.37332916720468e-03, -1.42647390514189e-02)


def _erf_f32(x):
    x = jnp.clip(x, -4.0, 4.0)
    x2 = x * x
    p = x2 * _ERF_ALPHA[0] + _ERF_ALPHA[1]
    for c in _ERF_ALPHA[2:]:
        p = p * x2 + c
    p = p * x
    q = x2 * _ERF_BETA[0] + _ERF_BETA[1]
    for c in _ERF_BETA[2:]:
        q = q * x2 + c
    # q is a strictly-negative polynomial (|q| >= ~0.014): approx reciprocal is safe.
    return p * pl.reciprocal(q, approx=True)


def _gelu(x):
    return 0.5 * x * (1.0 + _erf_f32(x * (1.0 / math.sqrt(2.0))))


# ---------------------------------------------------------------------------
# Fused Pallas kernel: whole network forward + Ising energy for one batch tile.
# ---------------------------------------------------------------------------
def fused_flow_kernel(x_ref, sin_ref,
                      tw1_ref, tw2_ref, tb12_ref,
                      wx_ref, wtall_ref, ball_ref,
                      wah_ref, wbr_ref, bbr_ref,
                      ow_ref, ob_ref, nmat_ref,
                      out_ref, *, num_res, hp):
    f32, bf16 = jnp.float32, jnp.bfloat16

    # ---- time-embedding MLP (sin features precomputed, zero in padded lanes) ----
    th = _gelu(jnp.dot(sin_ref[...].astype(bf16), tw1_ref[...],
                       preferred_element_type=f32) + tb12_ref[0])
    t_emb = jnp.dot(th.astype(bf16), tw2_ref[...],
                    preferred_element_type=f32) + tb12_ref[1]

    # ---- ALL t_emb contributions in one wide GEMM (input layer + residuals) -----
    # wt_all = [in_wt | wa_t_0 | ... | wa_t_{R-1}], b_all carries the matching biases
    t_all = jnp.dot(t_emb.astype(bf16), wtall_ref[...],
                    preferred_element_type=f32) + ball_ref[...]

    # ---- input layer; token-embedding gather folded into wx_ref (num_tokens=2) --
    x_f = x_ref[...].astype(f32)
    h = _gelu(jnp.dot(x_f.astype(bf16), wx_ref[...],
                      preferred_element_type=f32) + t_all[:, :hp])

    # ---- residual blocks (unrolled; switch to lax.fori_loop over the stacked
    #      slabs if num_layers grows beyond a handful) -----------------------------
    for i in range(num_res):
        pre = jnp.dot(h.astype(bf16), wah_ref[i],
                      preferred_element_type=f32) + t_all[:, (i + 1) * hp:(i + 2) * hp]
        h_res = _gelu(pre)
        h_res = _gelu(jnp.dot(h_res.astype(bf16), wbr_ref[i],
                              preferred_element_type=f32) + bbr_ref[i])
        h = h + h_res

    # ---- output head: VPU multiply + cross-lane reduce (no [H,1] MXU matmul) ----
    flow = jnp.sum(h * ow_ref[...], axis=-1, keepdims=True) + ob_ref[...]

    # ---- Ising energy fused in-kernel: E = -s^T N s (MXU + lane reduce) ---------
    # TODO(synk): energy_fn is an undefined constructor argument in the reference;
    # this is the periodic nearest-neighbour Ising energy on the sqrt(L) grid.
    s = 2.0 * x_f - 1.0
    sn = jnp.dot(s.astype(bf16), nmat_ref[...], preferred_element_type=f32)
    energy = -jnp.sum(s * sn, axis=-1, keepdims=True)

    out_ref[...] = flow - energy                 # = -energy + flow


# ---------------------------------------------------------------------------
# Host-side parameter construction / layout plumbing
# ---------------------------------------------------------------------------
def _neighbor_matrix(L):
    g = int(round(math.sqrt(L)))
    assert g * g == L, "seq_length must be a square grid"
    m = np.zeros((L, L), np.float32)
    for r in range(g):
        for c in range(g):
            l = r * g + c
            m[((r + 1) % g) * g + c, l] += 1.0   # down neighbour
            m[r * g + (c + 1) % g, l] += 1.0     # right neighbour
    return m


def init_params(key, num_tokens, seq_length, tok_emb_dim, hidden_dim, num_layers):
    """Module-shaped f32 parameters (Linear weights stored as [in, out])."""
    assert num_layers >= 2
    ks = iter(jax.random.split(key, 6 * num_layers + 16))

    def lin(fan_in, fan_out):
        return jax.random.normal(next(ks), (fan_in, fan_out), jnp.float32) / math.sqrt(fan_in)

    def bias(n):
        return jax.random.normal(next(ks), (n,), jnp.float32) * 0.01

    xdim = seq_length * tok_emb_dim
    p = {
        "token_embedding": jax.random.normal(next(ks), (num_tokens, tok_emb_dim), jnp.float32),
        "time_w1": lin(hidden_dim, hidden_dim), "time_b1": bias(hidden_dim),
        "time_w2": lin(hidden_dim, hidden_dim), "time_b2": bias(hidden_dim),
        "in_w": lin(xdim + hidden_dim, hidden_dim), "in_b": bias(hidden_dim),
        "res": [],
        "out_w": lin(hidden_dim, 1), "out_b": bias(1),
    }
    for _ in range(num_layers - 1):
        p["res"].append(dict(wa=lin(2 * hidden_dim, hidden_dim), ba=bias(hidden_dim),
                             wb=lin(hidden_dim, hidden_dim), bb=bias(hidden_dim)))
    return p


def pack_params(p, *, seq_length, tok_emb_dim, hidden_dim, hidden_pad=128):
    """Fold / pad / stack params into the kernel layout (one-time host work)."""
    L, tok, H, Hp = seq_length, tok_emb_dim, hidden_dim, hidden_pad
    assert H % 2 == 0 and H >= 4 and Hp >= H
    # TODO(synk): the embedding fold below is exact only for num_tokens == 2 (Ising
    # spins); general num_tokens would need a real gather / one-hot path.
    assert p["token_embedding"].shape[0] == 2
    bf = jnp.bfloat16

    def pad2(a, rows, cols):
        out = jnp.zeros((rows, cols), a.dtype)
        return out.at[:a.shape[0], :a.shape[1]].set(a)

    emb = p["token_embedding"]
    e0, de = emb[0], emb[1] - emb[0]
    wx = p["in_w"][:L * tok].reshape(L, tok, H)          # x_emb part of input Linear
    wt_in = p["in_w"][L * tok:]                          # t_emb part of input Linear
    wx_eff = jnp.einsum("d,ldh->lh", de, wx)             # x_emb gather folded into W
    c0 = jnp.einsum("d,ldh->h", e0, wx) + p["in_b"]      # constant part + input bias

    wt_blocks = [pad2(wt_in, Hp, Hp)]
    b_blocks = [pad2(c0[None, :], 1, Hp)]
    wah, wbr, bbr = [], [], []
    for r in p["res"]:
        wah.append(pad2(r["wa"][:H], Hp, Hp))            # h part of Linear(2H, H)
        wt_blocks.append(pad2(r["wa"][H:], Hp, Hp))      # t part -> hoisted wide GEMM
        b_blocks.append(pad2(r["ba"][None, :], 1, Hp))
        wbr.append(pad2(r["wb"], Hp, Hp))
        bbr.append(pad2(r["bb"][None, :], 1, Hp))

    half = H // 2
    f = jnp.exp(jnp.arange(half, dtype=jnp.float32) * -(math.log(10000.0) / (half - 1)))
    freqs = jnp.zeros((Hp,), jnp.float32).at[:half].set(f).at[half:2 * half].set(f)
    phase = jnp.zeros((Hp,), jnp.float32).at[half:2 * half].set(math.pi / 2.0)

    return dict(
        freqs=freqs, phase=phase,                                        # sin features
        tw1=pad2(p["time_w1"], Hp, Hp).astype(bf),
        tw2=pad2(p["time_w2"], Hp, Hp).astype(bf),
        tb12=jnp.stack([pad2(p["time_b1"][None, :], 1, Hp),
                        pad2(p["time_b2"][None, :], 1, Hp)]),            # [2,1,Hp] f32
        wx_eff=pad2(wx_eff, L, Hp).astype(bf),                           # [L,Hp]
        wt_all=jnp.concatenate(wt_blocks, axis=1).astype(bf),            # [Hp,(1+R)Hp]
        b_all=jnp.concatenate(b_blocks, axis=1),                         # [1,(1+R)Hp]
        wa_h=jnp.stack(wah).astype(bf),                                  # [R,Hp,Hp]
        wb=jnp.stack(wbr).astype(bf),                                    # [R,Hp,Hp]
        bb=jnp.stack(bbr),                                               # [R,1,Hp] f32
        ow=pad2(p["out_w"].T, 1, Hp),                                    # [1,Hp] f32
        ob=p["out_b"].reshape(1, 1),                                     # [1,1]  f32
        nmat=jnp.asarray(_neighbor_matrix(L), dtype=bf),                 # [L,L]
    )


# ---------------------------------------------------------------------------
# Forward wrapper: batch-tiled pallas_call
# ---------------------------------------------------------------------------
def _idx_batch(i):
    return (i, 0)


def _idx_full2(i):
    return (0, 0)


def _idx_full3(i):
    return (0, 0, 0)


def fl_discrete_state_flow_forward(packed, x, t, *, tile_b=8):
    """x: [B, L] int32 tokens, t: [B] float.  Returns [B] = -energy(x) + flow(x, t)."""
    B, L = x.shape
    Hp = packed["tw1"].shape[0]
    R = packed["wa_h"].shape[0]
    f32 = jnp.float32

    Bp = pl.cdiv(B, tile_b) * tile_b
    if Bp != B:
        x = jnp.pad(x, ((0, Bp - B), (0, 0)))
        t = jnp.pad(t, ((0, Bp - B),))

    # Sinusoidal time features (padded lanes get freq=phase=0 -> sin(0)=0, which the
    # zero-padded weight rows expect).  Kept outside the kernel (one tiny XLA op).
    sin_emb = jnp.sin(t.astype(f32)[:, None] * packed["freqs"][None, :]
                      + packed["phase"][None, :])

    w_names = ["tw1", "tw2", "tb12", "wx_eff", "wt_all", "b_all",
               "wa_h", "wb", "bb", "ow", "ob", "nmat"]
    weights = [packed[n] for n in w_names]

    in_specs = [pl.BlockSpec((tile_b, L), _idx_batch),
                pl.BlockSpec((tile_b, Hp), _idx_batch)]
    in_specs += [pl.BlockSpec(a.shape, _idx_full2 if a.ndim == 2 else _idx_full3)
                 for a in weights]
    out_spec = pl.BlockSpec((tile_b, 1), _idx_batch)

    flops = 2 * Bp * (2 * Hp * Hp + (1 + R) * Hp * Hp + L * Hp
                      + 2 * R * Hp * Hp + L * L)
    weight_bytes = sum(a.size * a.dtype.itemsize for a in weights)
    bytes_accessed = weight_bytes + x.size * 4 + sin_emb.size * 4 + Bp * 4
    transcendentals = Bp * (2 + 2 * R) * Hp          # approx-reciprocal per GELU elem

    out = pl.pallas_call(
        functools.partial(fused_flow_kernel, num_res=R, hp=Hp),
        out_shape=jax.ShapeDtypeStruct((Bp, 1), f32),
        grid=(Bp // tile_b,),
        in_specs=in_specs,
        out_specs=out_spec,
        compiler_params=pltpu.CompilerParams(
            dimension_semantics=("parallel",),
            vmem_limit_bytes=32 * 1024 * 1024),
        cost_estimate=pl.CostEstimate(flops=flops,
                                      transcendentals=transcendentals,
                                      bytes_accessed=bytes_accessed),
    )(x, sin_emb, *weights)
    return out[:B, 0]


if __name__ == "__main__":
    key = jax.random.PRNGKey(0)
    num_tokens = 2          # Ising spins
    seq_length = 64         # 8x8 grid
    tok_emb_dim = 4
    hidden_dim = 64         # module default; padded to 128 lanes in the kernel
    num_layers = 3
    batch = 16              # -> grid of 2 batch tiles (parallel -> 2 TCs on v7x)

    kp, kx, kt = jax.random.split(key, 3)
    params = init_params(kp, num_tokens, seq_length, tok_emb_dim, hidden_dim, num_layers)
    packed = pack_params(params, seq_length=seq_length, tok_emb_dim=tok_emb_dim,
                         hidden_dim=hidden_dim, hidden_pad=128)

    x = jax.random.randint(kx, (batch, seq_length), 0, num_tokens, dtype=jnp.int32)
    t = jax.random.uniform(kt, (batch,), dtype=jnp.float32)

    fwd = jax.jit(functools.partial(fl_discrete_state_flow_forward, tile_b=8))
    flow = jax.block_until_ready(fwd(packed, x, t))

    assert flow.shape == (batch,) and flow.dtype == jnp.float32
    assert bool(jnp.all(jnp.isfinite(flow)))
    print("KERNEL_OK")
</pallas_src>

<mosaic_0001>
module attributes {stable_mosaic.version = 11 : i64} {
  func.func @fused_flow_kernel(%arg0: i32, %arg1: memref<8x64xi32, #tpu.memory_space<vmem>>, %arg2: memref<8x128xf32, #tpu.memory_space<vmem>>, %arg3: memref<128x128xbf16, #tpu.memory_space<vmem>>, %arg4: memref<128x128xbf16, #tpu.memory_space<vmem>>, %arg5: memref<2x1x128xf32, #tpu.memory_space<vmem>>, %arg6: memref<64x128xbf16, #tpu.memory_space<vmem>>, %arg7: memref<128x384xbf16, #tpu.memory_space<vmem>>, %arg8: memref<1x384xf32, #tpu.memory_space<vmem>>, %arg9: memref<2x128x128xbf16, #tpu.memory_space<vmem>>, %arg10: memref<2x128x128xbf16, #tpu.memory_space<vmem>>, %arg11: memref<2x1x128xf32, #tpu.memory_space<vmem>>, %arg12: memref<1x128xf32, #tpu.memory_space<vmem>>, %arg13: memref<1x1xf32, #tpu.memory_space<vmem>>, %arg14: memref<64x64xbf16, #tpu.memory_space<vmem>>, %arg15: memref<8x1xf32, #tpu.memory_space<vmem>>) attributes {dimension_semantics = [#tpu.dimension_semantics<parallel>], iteration_bounds = array<i64: 2>, scalar_prefetch = 0 : i64, scratch_operands = 0 : i64, tpu.core_type = #tpu.core_type<tc>, window_params = [{transform_indices = @transform_0, window_bounds = array<i64: 8, 64>}, {transform_indices = @transform_1, window_bounds = array<i64: 8, 128>}, {pipeline_mode = #tpu.pipeline_mode<synchronous>, transform_indices = @transform_2, window_bounds = array<i64: 128, 128>}, {pipeline_mode = #tpu.pipeline_mode<synchronous>, transform_indices = @transform_3, window_bounds = array<i64: 128, 128>}, {pipeline_mode = #tpu.pipeline_mode<synchronous>, transform_indices = @transform_4, window_bounds = array<i64: 2, 1, 128>}, {pipeline_mode = #tpu.pipeline_mode<synchronous>, transform_indices = @transform_5, window_bounds = array<i64: 64, 128>}, {pipeline_mode = #tpu.pipeline_mode<synchronous>, transform_indices = @transform_6, window_bounds = array<i64: 128, 384>}, {pipeline_mode = #tpu.pipeline_mode<synchronous>, transform_indices = @transform_7, window_bounds = array<i64: 1, 384>}, {pipeline_mode = #tpu.pipeline_mode<synchronous>, transform_indices = @transform_8, window_bounds = array<i64: 2, 128, 128>}, {pipeline_mode = #tpu.pipeline_mode<synchronous>, transform_indices = @transform_9, window_bounds = array<i64: 2, 128, 128>}, {pipeline_mode = #tpu.pipeline_mode<synchronous>, transform_indices = @transform_10, window_bounds = array<i64: 2, 1, 128>}, {pipeline_mode = #tpu.pipeline_mode<synchronous>, transform_indices = @transform_11, window_bounds = array<i64: 1, 128>}, {pipeline_mode = #tpu.pipeline_mode<synchronous>, transform_indices = @transform_12, window_bounds = array<i64: 1, 1>}, {pipeline_mode = #tpu.pipeline_mode<synchronous>, transform_indices = @transform_13, window_bounds = array<i64: 64, 64>}, {transform_indices = @transform_14, window_bounds = array<i64: 8, 1>}]} {
    %c0 = arith.constant 0 : index
    %c0_0 = arith.constant 0 : index
    %0 = vector.load %arg2[%c0, %c0_0] : memref<8x128xf32, #tpu.memory_space<vmem>>, vector<8x128xf32>
    %1 = arith.truncf %0 : vector<8x128xf32> to vector<8x128xbf16>
    %c0_1 = arith.constant 0 : index
    %c0_2 = arith.constant 0 : index
    %2 = vector.load %arg3[%c0_1, %c0_2] : memref<128x128xbf16, #tpu.memory_space<vmem>>, vector<128x128xbf16>
    %cst = arith.constant dense<0.000000e+00> : vector<8x128xf32>
    %3 = tpu.matmul %1, %2, %cst {dimension_numbers = #tpu.dot_dimension_numbers<[1], [0], [0], [1], [0, 0, 1, 1], [], []>} : vector<8x128xbf16>, vector<128x128xbf16>, vector<8x128xf32> -> vector<8x128xf32>
    %c0_3 = arith.constant 0 : index
    %c0_4 = arith.constant 0 : index
    %c0_5 = arith.constant 0 : index
    %4 = vector.load %arg5[%c0_3, %c0_4, %c0_5] : memref<2x1x128xf32, #tpu.memory_space<vmem>>, vector<1x1x128xf32>
    %5 = vector.shape_cast %4 : vector<1x1x128xf32> to vector<1x128xf32>
    %6 = vector.broadcast %5 : vector<1x128xf32> to vector<8x128xf32>
    %7 = arith.addf %3, %6 : vector<8x128xf32>
    %cst_6 = arith.constant 5.000000e-01 : f32
    %8 = vector.broadcast %cst_6 : f32 to vector<8x128xf32>
    %9 = arith.mulf %8, %7 : vector<8x128xf32>
    %cst_7 = arith.constant 0.707106769 : f32
    %10 = vector.broadcast %cst_7 : f32 to vector<8x128xf32>
    %11 = arith.mulf %7, %10 : vector<8x128xf32>
    %cst_8 = arith.constant -4.000000e+00 : f32
    %cst_9 = arith.constant 4.000000e+00 : f32
    %12 = vector.broadcast %cst_8 : f32 to vector<8x128xf32>
    %13 = arith.maximumf %12, %11 : vector<8x128xf32>
    %14 = vector.broadcast %cst_9 : f32 to vector<8x128xf32>
    %15 = arith.minimumf %14, %13 : vector<8x128xf32>
    %16 = arith.mulf %15, %15 : vector<8x128xf32>
    %cst_10 = arith.constant -2.72614237E-10 : f32
    %17 = vector.broadcast %cst_10 : f32 to vector<8x128xf32>
    %18 = arith.mulf %16, %17 : vector<8x128xf32>
    %cst_11 = arith.constant 2.77068146E-8 : f32
    %19 = vector.broadcast %cst_11 : f32 to vector<8x128xf32>
    %20 = arith.addf %18, %19 : vector<8x128xf32>
    %21 = arith.mulf %20, %16 : vector<8x128xf32>
    %cst_12 = arith.constant -2.10102394E-6 : f32
    %22 = vector.broadcast %cst_12 : f32 to vector<8x128xf32>
    %23 = arith.addf %21, %22 : vector<8x128xf32>
    %24 = arith.mulf %23, %16 : vector<8x128xf32>
    %cst_13 = arith.constant -5.69250624E-5 : f32
    %25 = vector.broadcast %cst_13 : f32 to vector<8x128xf32>
    %26 = arith.addf %24, %25 : vector<8x128xf32>
    %27 = arith.mulf %26, %16 : vector<8x128xf32>
    %cst_14 = arith.constant -7.34990637E-4 : f32
    %28 = vector.broadcast %cst_14 : f32 to vector<8x128xf32>
    %29 = arith.addf %27, %28 : vector<8x128xf32>
    %30 = arith.mulf %29, %16 : vector<8x128xf32>
    %cst_15 = arith.constant -2.954600e-03 : f32
    %31 = vector.broadcast %cst_15 : f32 to vector<8x128xf32>
    %32 = arith.addf %30, %31 : vector<8x128xf32>
    %33 = arith.mulf %32, %16 : vector<8x128xf32>
    %cst_16 = arith.constant -0.0160960332 : f32
    %34 = vector.broadcast %cst_16 : f32 to vector<8x128xf32>
    %35 = arith.addf %33, %34 : vector<8x128xf32>
    %36 = arith.mulf %35, %15 : vector<8x128xf32>
    %cst_17 = arith.constant -1.45660715E-5 : f32
    %37 = vector.broadcast %cst_17 : f32 to vector<8x128xf32>
    %38 = arith.mulf %16, %37 : vector<8x128xf32>
    %cst_18 = arith.constant -2.13374049E-4 : f32
    %39 = vector.broadcast %cst_18 : f32 to vector<8x128xf32>
    %40 = arith.addf %38, %39 : vector<8x128xf32>
    %41 = arith.mulf %40, %16 : vector<8x128xf32>
    %cst_19 = arith.constant -0.00168282702 : f32
    %42 = vector.broadcast %cst_19 : f32 to vector<8x128xf32>
    %43 = arith.addf %41, %42 : vector<8x128xf32>
    %44 = arith.mulf %43, %16 : vector<8x128xf32>
    %cst_20 = arith.constant -0.00737332925 : f32
    %45 = vector.broadcast %cst_20 : f32 to vector<8x128xf32>
    %46 = arith.addf %44, %45 : vector<8x128xf32>
    %47 = arith.mulf %46, %16 : vector<8x128xf32>
    %cst_21 = arith.constant -0.0142647391 : f32
    %48 = vector.broadcast %cst_21 : f32 to vector<8x128xf32>
    %49 = arith.addf %47, %48 : vector<8x128xf32>
    %50 = tpu.reciprocal %49 {approx = true} : vector<8x128xf32> -> vector<8x128xf32>
    %51 = arith.mulf %36, %50 : vector<8x128xf32>
    %cst_22 = arith.constant 1.000000e+00 : f32
    %52 = vector.broadcast %cst_22 : f32 to vector<8x128xf32>
    %53 = arith.addf %52, %51 : vector<8x128xf32>
    %54 = arith.mulf %9, %53 : vector<8x128xf32>
    %55 = arith.truncf %54 : vector<8x128xf32> to vector<8x128xbf16>
    %c0_23 = arith.constant 0 : index
    %c0_24 = arith.constant 0 : index
    %56 = vector.load %arg4[%c0_23, %c0_24] : memref<128x128xbf16, #tpu.memory_space<vmem>>, vector<128x128xbf16>
    %cst_25 = arith.constant dense<0.000000e+00> : vector<8x128xf32>
    %57 = tpu.matmul %55, %56, %cst_25 {dimension_numbers = #tpu.dot_dimension_numbers<[1], [0], [0], [1], [0, 0, 1, 1], [], []>} : vector<8x128xbf16>, vector<128x128xbf16>, vector<8x128xf32> -> vector<8x128xf32>
    %c1 = arith.constant 1 : index
    %c0_26 = arith.constant 0 : index
    %c0_27 = arith.constant 0 : index
    %58 = vector.load %arg5[%c1, %c0_26, %c0_27] : memref<2x1x128xf32, #tpu.memory_space<vmem>>, vector<1x1x128xf32>
    %59 = vector.shape_cast %58 : vector<1x1x128xf32> to vector<1x128xf32>
    %60 = vector.broadcast %59 : vector<1x128xf32> to vector<8x128xf32>
    %61 = arith.addf %57, %60 : vector<8x128xf32>
    %62 = arith.truncf %61 : vector<8x128xf32> to vector<8x128xbf16>
    %c0_28 = arith.constant 0 : index
    %c0_29 = arith.constant 0 : index
    %63 = vector.load %arg7[%c0_28, %c0_29] : memref<128x384xbf16, #tpu.memory_space<vmem>>, vector<128x384xbf16>
    %cst_30 = arith.constant dense<0.000000e+00> : vector<8x384xf32>
    %64 = tpu.matmul %62, %63, %cst_30 {dimension_numbers = #tpu.dot_dimension_numbers<[1], [0], [0], [1], [0, 0, 1, 1], [], []>} : vector<8x128xbf16>, vector<128x384xbf16>, vector<8x384xf32> -> vector<8x384xf32>
    %c0_31 = arith.constant 0 : index
    %c0_32 = arith.constant 0 : index
    %65 = vector.load %arg8[%c0_31, %c0_32] : memref<1x384xf32, #tpu.memory_space<vmem>>, vector<1x384xf32>
    %66 = vector.broadcast %65 : vector<1x384xf32> to vector<8x384xf32>
    %67 = arith.addf %64, %66 : vector<8x384xf32>
    %c0_33 = arith.constant 0 : index
    %c0_34 = arith.constant 0 : index
    %68 = vector.load %arg1[%c0_33, %c0_34] : memref<8x64xi32, #tpu.memory_space<vmem>>, vector<8x64xi32>
    %69 = arith.sitofp %68 : vector<8x64xi32> to vector<8x64xf32>
    %70 = arith.truncf %69 : vector<8x64xf32> to vector<8x64xbf16>
    %c0_35 = arith.constant 0 : index
    %c0_36 = arith.constant 0 : index
    %71 = vector.load %arg6[%c0_35, %c0_36] : memref<64x128xbf16, #tpu.memory_space<vmem>>, vector<64x128xbf16>
    %cst_37 = arith.constant dense<0.000000e+00> : vector<8x128xf32>
    %72 = tpu.matmul %70, %71, %cst_37 {dimension_numbers = #tpu.dot_dimension_numbers<[1], [0], [0], [1], [0, 0, 1, 1], [], []>} : vector<8x64xbf16>, vector<64x128xbf16>, vector<8x128xf32> -> vector<8x128xf32>
    %73 = vector.extract_strided_slice %67 {offsets = [0, 0], sizes = [8, 128], strides = [1, 1]} : vector<8x384xf32> to vector<8x128xf32>
    %74 = arith.addf %72, %73 : vector<8x128xf32>
    %cst_38 = arith.constant 5.000000e-01 : f32
    %75 = vector.broadcast %cst_38 : f32 to vector<8x128xf32>
    %76 = arith.mulf %75, %74 : vector<8x128xf32>
    %cst_39 = arith.constant 0.707106769 : f32
    %77 = vector.broadcast %cst_39 : f32 to vector<8x128xf32>
    %78 = arith.mulf %74, %77 : vector<8x128xf32>
    %cst_40 = arith.constant -4.000000e+00 : f32
    %cst_41 = arith.constant 4.000000e+00 : f32
    %79 = vector.broadcast %cst_40 : f32 to vector<8x128xf32>
    %80 = arith.maximumf %79, %78 : vector<8x128xf32>
    %81 = vector.broadcast %cst_41 : f32 to vector<8x128xf32>
    %82 = arith.minimumf %81, %80 : vector<8x128xf32>
    %83 = arith.mulf %82, %82 : vector<8x128xf32>
    %cst_42 = arith.constant -2.72614237E-10 : f32
    %84 = vector.broadcast %cst_42 : f32 to vector<8x128xf32>
    %85 = arith.mulf %83, %84 : vector<8x128xf32>
    %cst_43 = arith.constant 2.77068146E-8 : f32
    %86 = vector.broadcast %cst_43 : f32 to vector<8x128xf32>
    %87 = arith.addf %85, %86 : vector<8x128xf32>
    %88 = arith.mulf %87, %83 : vector<8x128xf32>
    %cst_44 = arith.constant -2.10102394E-6 : f32
    %89 = vector.broadcast %cst_44 : f32 to vector<8x128xf32>
    %90 = arith.addf %88, %89 : vector<8x128xf32>
    %91 = arith.mulf %90, %83 : vector<8x128xf32>
    %cst_45 = arith.constant -5.69250624E-5 : f32
    %92 = vector.broadcast %cst_45 : f32 to vector<8x128xf32>
    %93 = arith.addf %91, %92 : vector<8x128xf32>
    %94 = arith.mulf %93, %83 : vector<8x128xf32>
    %cst_46 = arith.constant -7.34990637E-4 : f32
    %95 = vector.broadcast %cst_46 : f32 to vector<8x128xf32>
    %96 = arith.addf %94, %95 : vector<8x128xf32>
    %97 = arith.mulf %96, %83 : vector<8x128xf32>
    %cst_47 = arith.constant -2.954600e-03 : f32
    %98 = vector.broadcast %cst_47 : f32 to vector<8x128xf32>
    %99 = arith.addf %97, %98 : vector<8x128xf32>
    %100 = arith.mulf %99, %83 : vector<8x128xf32>
    %cst_48 = arith.constant -0.0160960332 : f32
    %101 = vector.broadcast %cst_48 : f32 to vector<8x128xf32>
    %102 = arith.addf %100, %101 : vector<8x128xf32>
    %103 = arith.mulf %102, %82 : vector<8x128xf32>
    %cst_49 = arith.constant -1.45660715E-5 : f32
    %104 = vector.broadcast %cst_49 : f32 to vector<8x128xf32>
    %105 = arith.mulf %83, %104 : vector<8x128xf32>
    %cst_50 = arith.constant -2.13374049E-4 : f32
    %106 = vector.broadcast %cst_50 : f32 to vector<8x128xf32>
    %107 = arith.addf %105, %106 : vector<8x128xf32>
    %108 = arith.mulf %107, %83 : vector<8x128xf32>
    %cst_51 = arith.constant -0.00168282702 : f32
    %109 = vector.broadcast %cst_51 : f32 to vector<8x128xf32>
    %110 = arith.addf %108, %109 : vector<8x128xf32>
    %111 = arith.mulf %110, %83 : vector<8x128xf32>
    %cst_52 = arith.constant -0.00737332925 : f32
    %112 = vector.broadcast %cst_52 : f32 to vector<8x128xf32>
    %113 = arith.addf %111, %112 : vector<8x128xf32>
    %114 = arith.mulf %113, %83 : vector<8x128xf32>
    %cst_53 = arith.constant -0.0142647391 : f32
    %115 = vector.broadcast %cst_53 : f32 to vector<8x128xf32>
    %116 = arith.addf %114, %115 : vector<8x128xf32>
    %117 = tpu.reciprocal %116 {approx = true} : vector<8x128xf32> -> vector<8x128xf32>
    %118 = arith.mulf %103, %117 : vector<8x128xf32>
    %cst_54 = arith.constant 1.000000e+00 : f32
    %119 = vector.broadcast %cst_54 : f32 to vector<8x128xf32>
    %120 = arith.addf %119, %118 : vector<8x128xf32>
    %121 = arith.mulf %76, %120 : vector<8x128xf32>
    %122 = arith.truncf %121 : vector<8x128xf32> to vector<8x128xbf16>
    %c0_55 = arith.constant 0 : index
    %c0_56 = arith.constant 0 : index
    %c0_57 = arith.constant 0 : index
    %123 = vector.load %arg9[%c0_55, %c0_56, %c0_57] : memref<2x128x128xbf16, #tpu.memory_space<vmem>>, vector<1x128x128xbf16>
    %124 = vector.shape_cast %123 : vector<1x128x128xbf16> to vector<128x128xbf16>
    %cst_58 = arith.constant dense<0.000000e+00> : vector<8x128xf32>
    %125 = tpu.matmul %122, %124, %cst_58 {dimension_numbers = #tpu.dot_dimension_numbers<[1], [0], [0], [1], [0, 0, 1, 1], [], []>} : vector<8x128xbf16>, vector<128x128xbf16>, vector<8x128xf32> -> vector<8x128xf32>
    %126 = vector.extract_strided_slice %67 {offsets = [0, 128], sizes = [8, 128], strides = [1, 1]} : vector<8x384xf32> to vector<8x128xf32>
    %127 = arith.addf %125, %126 : vector<8x128xf32>
    %cst_59 = arith.constant 5.000000e-01 : f32
    %128 = vector.broadcast %cst_59 : f32 to vector<8x128xf32>
    %129 = arith.mulf %128, %127 : vector<8x128xf32>
    %cst_60 = arith.constant 0.707106769 : f32
    %130 = vector.broadcast %cst_60 : f32 to vector<8x128xf32>
    %131 = arith.mulf %127, %130 : vector<8x128xf32>
    %cst_61 = arith.constant -4.000000e+00 : f32
    %cst_62 = arith.constant 4.000000e+00 : f32
    %132 = vector.broadcast %cst_61 : f32 to vector<8x128xf32>
    %133 = arith.maximumf %132, %131 : vector<8x128xf32>
    %134 = vector.broadcast %cst_62 : f32 to vector<8x128xf32>
    %135 = arith.minimumf %134, %133 : vector<8x128xf32>
    %136 = arith.mulf %135, %135 : vector<8x128xf32>
    %cst_63 = arith.constant -2.72614237E-10 : f32
    %137 = vector.broadcast %cst_63 : f32 to vector<8x128xf32>
    %138 = arith.mulf %136, %137 : vector<8x128xf32>
    %cst_64 = arith.constant 2.77068146E-8 : f32
    %139 = vector.broadcast %cst_64 : f32 to vector<8x128xf32>
    %140 = arith.addf %138, %139 : vector<8x128xf32>
    %141 = arith.mulf %140, %136 : vector<8x128xf32>
    %cst_65 = arith.constant -2.10102394E-6 : f32
    %142 = vector.broadcast %cst_65 : f32 to vector<8x128xf32>
    %143 = arith.addf %141, %142 : vector<8x128xf32>
    %144 = arith.mulf %143, %136 : vector<8x128xf32>
    %cst_66 = arith.constant -5.69250624E-5 : f32
    %145 = vector.broadcast %cst_66 : f32 to vector<8x128xf32>
    %146 = arith.addf %144, %145 : vector<8x128xf32>
    %147 = arith.mulf %146, %136 : vector<8x128xf32>
    %cst_67 = arith.constant -7.34990637E-4 : f32
    %148 = vector.broadcast %cst_67 : f32 to vector<8x128xf32>
    %149 = arith.addf %147, %148 : vector<8x128xf32>
    %150 = arith.mulf %149, %136 : vector<8x128xf32>
    %cst_68 = arith.constant -2.954600e-03 : f32
    %151 = vector.broadcast %cst_68 : f32 to vector<8x128xf32>
    %152 = arith.addf %150, %151 : vector<8x128xf32>
    %153 = arith.mulf %152, %136 : vector<8x128xf32>
    %cst_69 = arith.constant -0.0160960332 : f32
    %154 = vector.broadcast %cst_69 : f32 to vector<8x128xf32>
    %155 = arith.addf %153, %154 : vector<8x128xf32>
    %156 = arith.mulf %155, %135 : vector<8x128xf32>
    %cst_70 = arith.constant -1.45660715E-5 : f32
    %157 = vector.broadcast %cst_70 : f32 to vector<8x128xf32>
    %158 = arith.mulf %136, %157 : vector<8x128xf32>
    %cst_71 = arith.constant -2.13374049E-4 : f32
    %159 = vector.broadcast %cst_71 : f32 to vector<8x128xf32>
    %160 = arith.addf %158, %159 : vector<8x128xf32>
    %161 = arith.mulf %160, %136 : vector<8x128xf32>
    %cst_72 = arith.constant -0.00168282702 : f32
    %162 = vector.broadcast %cst_72 : f32 to vector<8x128xf32>
    %163 = arith.addf %161, %162 : vector<8x128xf32>
    %164 = arith.mulf %163, %136 : vector<8x128xf32>
    %cst_73 = arith.constant -0.00737332925 : f32
    %165 = vector.broadcast %cst_73 : f32 to vector<8x128xf32>
    %166 = arith.addf %164, %165 : vector<8x128xf32>
    %167 = arith.mulf %166, %136 : vector<8x128xf32>
    %cst_74 = arith.constant -0.0142647391 : f32
    %168 = vector.broadcast %cst_74 : f32 to vector<8x128xf32>
    %169 = arith.addf %167, %168 : vector<8x128xf32>
    %170 = tpu.reciprocal %169 {approx = true} : vector<8x128xf32> -> vector<8x128xf32>
    %171 = arith.mulf %156, %170 : vector<8x128xf32>
    %cst_75 = arith.constant 1.000000e+00 : f32
    %172 = vector.broadcast %cst_75 : f32 to vector<8x128xf32>
    %173 = arith.addf %172, %171 : vector<8x128xf32>
    %174 = arith.mulf %129, %173 : vector<8x128xf32>
    %175 = arith.truncf %174 : vector<8x128xf32> to vector<8x128xbf16>
    %c0_76 = arith.constant 0 : index
    %c0_77 = arith.constant 0 : index
    %c0_78 = arith.constant 0 : index
    %176 = vector.load %arg10[%c0_76, %c0_77, %c0_78] : memref<2x128x128xbf16, #tpu.memory_space<vmem>>, vector<1x128x128xbf16>
    %177 = vector.shape_cast %176 : vector<1x128x128xbf16> to vector<128x128xbf16>
    %cst_79 = arith.constant dense<0.000000e+00> : vector<8x128xf32>
    %178 = tpu.matmul %175, %177, %cst_79 {dimension_numbers = #tpu.dot_dimension_numbers<[1], [0], [0], [1], [0, 0, 1, 1], [], []>} : vector<8x128xbf16>, vector<128x128xbf16>, vector<8x128xf32> -> vector<8x128xf32>
    %c0_80 = arith.constant 0 : index
    %c0_81 = arith.constant 0 : index
    %c0_82 = arith.constant 0 : index
    %179 = vector.load %arg11[%c0_80, %c0_81, %c0_82] : memref<2x1x128xf32, #tpu.memory_space<vmem>>, vector<1x1x128xf32>
    %180 = vector.shape_cast %179 : vector<1x1x128xf32> to vector<1x128xf32>
    %181 = vector.broadcast %180 : vector<1x128xf32> to vector<8x128xf32>
    %182 = arith.addf %178, %181 : vector<8x128xf32>
    %cst_83 = arith.constant 5.000000e-01 : f32
    %183 = vector.broadcast %cst_83 : f32 to vector<8x128xf32>
    %184 = arith.mulf %183, %182 : vector<8x128xf32>
    %cst_84 = arith.constant 0.707106769 : f32
    %185 = vector.broadcast %cst_84 : f32 to vector<8x128xf32>
    %186 = arith.mulf %182, %185 : vector<8x128xf32>
    %cst_85 = arith.constant -4.000000e+00 : f32
    %cst_86 = arith.constant 4.000000e+00 : f32
    %187 = vector.broadcast %cst_85 : f32 to vector<8x128xf32>
    %188 = arith.maximumf %187, %186 : vector<8x128xf32>
    %189 = vector.broadcast %cst_86 : f32 to vector<8x128xf32>
    %190 = arith.minimumf %189, %188 : vector<8x128xf32>
    %191 = arith.mulf %190, %190 : vector<8x128xf32>
    %cst_87 = arith.constant -2.72614237E-10 : f32
    %192 = vector.broadcast %cst_87 : f32 to vector<8x128xf32>
    %193 = arith.mulf %191, %192 : vector<8x128xf32>
    %cst_88 = arith.constant 2.77068146E-8 : f32
    %194 = vector.broadcast %cst_88 : f32 to vector<8x128xf32>
    %195 = arith.addf %193, %194 : vector<8x128xf32>
    %196 = arith.mulf %195, %191 : vector<8x128xf32>
    %cst_89 = arith.constant -2.10102394E-6 : f32
    %197 = vector.broadcast %cst_89 : f32 to vector<8x128xf32>
    %198 = arith.addf %196, %197 : vector<8x128xf32>
    %199 = arith.mulf %198, %191 : vector<8x128xf32>
    %cst_90 = arith.constant -5.69250624E-5 : f32
    %200 = vector.broadcast %cst_90 : f32 to vector<8x128xf32>
    %201 = arith.addf %199, %200 : vector<8x128xf32>
    %202 = arith.mulf %201, %191 : vector<8x128xf32>
    %cst_91 = arith.constant -7.34990637E-4 : f32
    %203 = vector.broadcast %cst_91 : f32 to vector<8x128xf32>
    %204 = arith.addf %202, %203 : vector<8x128xf32>
    %205 = arith.mulf %204, %191 : vector<8x128xf32>
    %cst_92 = arith.constant -2.954600e-03 : f32
    %206 = vector.broadcast %cst_92 : f32 to vector<8x128xf32>
    %207 = arith.addf %205, %206 : vector<8x128xf32>
    %208 = arith.mulf %207, %191 : vector<8x128xf32>
    %cst_93 = arith.constant -0.0160960332 : f32
    %209 = vector.broadcast %cst_93 : f32 to vector<8x128xf32>
    %210 = arith.addf %208, %209 : vector<8x128xf32>
    %211 = arith.mulf %210, %190 : vector<8x128xf32>
    %cst_94 = arith.constant -1.45660715E-5 : f32
    %212 = vector.broadcast %cst_94 : f32 to vector<8x128xf32>
    %213 = arith.mulf %191, %212 : vector<8x128xf32>
    %cst_95 = arith.constant -2.13374049E-4 : f32
    %214 = vector.broadcast %cst_95 : f32 to vector<8x128xf32>
    %215 = arith.addf %213, %214 : vector<8x128xf32>
    %216 = arith.mulf %215, %191 : vector<8x128xf32>
    %cst_96 = arith.constant -0.00168282702 : f32
    %217 = vector.broadcast %cst_96 : f32 to vector<8x128xf32>
    %218 = arith.addf %216, %217 : vector<8x128xf32>
    %219 = arith.mulf %218, %191 : vector<8x128xf32>
    %cst_97 = arith.constant -0.00737332925 : f32
    %220 = vector.broadcast %cst_97 : f32 to vector<8x128xf32>
    %221 = arith.addf %219, %220 : vector<8x128xf32>
    %222 = arith.mulf %221, %191 : vector<8x128xf32>
    %cst_98 = arith.constant -0.0142647391 : f32
    %223 = vector.broadcast %cst_98 : f32 to vector<8x128xf32>
    %224 = arith.addf %222, %223 : vector<8x128xf32>
    %225 = tpu.reciprocal %224 {approx = true} : vector<8x128xf32> -> vector<8x128xf32>
    %226 = arith.mulf %211, %225 : vector<8x128xf32>
    %cst_99 = arith.constant 1.000000e+00 : f32
    %227 = vector.broadcast %cst_99 : f32 to vector<8x128xf32>
    %228 = arith.addf %227, %226 : vector<8x128xf32>
    %229 = arith.mulf %184, %228 : vector<8x128xf32>
    %230 = arith.addf %121, %229 : vector<8x128xf32>
    %231 = arith.truncf %230 : vector<8x128xf32> to vector<8x128xbf16>
    %c1_100 = arith.constant 1 : index
    %c0_101 = arith.constant 0 : index
    %c0_102 = arith.constant 0 : index
    %232 = vector.load %arg9[%c1_100, %c0_101, %c0_102] : memref<2x128x128xbf16, #tpu.memory_space<vmem>>, vector<1x128x128xbf16>
    %233 = vector.shape_cast %232 : vector<1x128x128xbf16> to vector<128x128xbf16>
    %cst_103 = arith.constant dense<0.000000e+00> : vector<8x128xf32>
    %234 = tpu.matmul %231, %233, %cst_103 {dimension_numbers = #tpu.dot_dimension_numbers<[1], [0], [0], [1], [0, 0, 1, 1], [], []>} : vector<8x128xbf16>, vector<128x128xbf16>, vector<8x128xf32> -> vector<8x128xf32>
    %235 = vector.extract_strided_slice %67 {offsets = [0, 256], sizes = [8, 128], strides = [1, 1]} : vector<8x384xf32> to vector<8x128xf32>
    %236 = arith.addf %234, %235 : vector<8x128xf32>
    %cst_104 = arith.constant 5.000000e-01 : f32
    %237 = vector.broadcast %cst_104 : f32 to vector<8x128xf32>
    %238 = arith.mulf %237, %236 : vector<8x128xf32>
    %cst_105 = arith.constant 0.707106769 : f32
    %239 = vector.broadcast %cst_105 : f32 to vector<8x128xf32>
    %240 = arith.mulf %236, %239 : vector<8x128xf32>
    %cst_106 = arith.constant -4.000000e+00 : f32
    %cst_107 = arith.constant 4.000000e+00 : f32
    %241 = vector.broadcast %cst_106 : f32 to vector<8x128xf32>
    %242 = arith.maximumf %241, %240 : vector<8x128xf32>
    %243 = vector.broadcast %cst_107 : f32 to vector<8x128xf32>
    %244 = arith.minimumf %243, %242 : vector<8x128xf32>
    %245 = arith.mulf %244, %244 : vector<8x128xf32>
    %cst_108 = arith.constant -2.72614237E-10 : f32
    %246 = vector.broadcast %cst_108 : f32 to vector<8x128xf32>
    %247 = arith.mulf %245, %246 : vector<8x128xf32>
    %cst_109 = arith.constant 2.77068146E-8 : f32
    %248 = vector.broadcast %cst_109 : f32 to vector<8x128xf32>
    %249 = arith.addf %247, %248 : vector<8x128xf32>
    %250 = arith.mulf %249, %245 : vector<8x128xf32>
    %cst_110 = arith.constant -2.10102394E-6 : f32
    %251 = vector.broadcast %cst_110 : f32 to vector<8x128xf32>
    %252 = arith.addf %250, %251 : vector<8x128xf32>
    %253 = arith.mulf %252, %245 : vector<8x128xf32>
    %cst_111 = arith.constant -5.69250624E-5 : f32
    %254 = vector.broadcast %cst_111 : f32 to vector<8x128xf32>
    %255 = arith.addf %253, %254 : vector<8x128xf32>
    %256 = arith.mulf %255, %245 : vector<8x128xf32>
    %cst_112 = arith.constant -7.34990637E-4 : f32
    %257 = vector.broadcast %cst_112 : f32 to vector<8x128xf32>
    %258 = arith.addf %256, %257 : vector<8x128xf32>
    %259 = arith.mulf %258, %245 : vector<8x128xf32>
    %cst_113 = arith.constant -2.954600e-03 : f32
    %260 = vector.broadcast %cst_113 : f32 to vector<8x128xf32>
    %261 = arith.addf %259, %260 : vector<8x128xf32>
    %262 = arith.mulf %261, %245 : vector<8x128xf32>
    %cst_114 = arith.constant -0.0160960332 : f32
    %263 = vector.broadcast %cst_114 : f32 to vector<8x128xf32>
    %264 = arith.addf %262, %263 : vector<8x128xf32>
    %265 = arith.mulf %264, %244 : vector<8x128xf32>
    %cst_115 = arith.constant -1.45660715E-5 : f32
    %266 = vector.broadcast %cst_115 : f32 to vector<8x128xf32>
    %267 = arith.mulf %245, %266 : vector<8x128xf32>
    %cst_116 = arith.constant -2.13374049E-4 : f32
    %268 = vector.broadcast %cst_116 : f32 to vector<8x128xf32>
    %269 = arith.addf %267, %268 : vector<8x128xf32>
    %270 = arith.mulf %269, %245 : vector<8x128xf32>
    %cst_117 = arith.constant -0.00168282702 : f32
    %271 = vector.broadcast %cst_117 : f32 to vector<8x128xf32>
    %272 = arith.addf %270, %271 : vector<8x128xf32>
    %273 = arith.mulf %272, %245 : vector<8x128xf32>
    %cst_118 = arith.constant -0.00737332925 : f32
    %274 = vector.broadcast %cst_118 : f32 to vector<8x128xf32>
    %275 = arith.addf %273, %274 : vector<8x128xf32>
    %276 = arith.mulf %275, %245 : vector<8x128xf32>
    %cst_119 = arith.constant -0.0142647391 : f32
    %277 = vector.broadcast %cst_119 : f32 to vector<8x128xf32>
    %278 = arith.addf %276, %277 : vector<8x128xf32>
    %279 = tpu.reciprocal %278 {approx = true} : vector<8x128xf32> -> vector<8x128xf32>
    %280 = arith.mulf %265, %279 : vector<8x128xf32>
    %cst_120 = arith.constant 1.000000e+00 : f32
    %281 = vector.broadcast %cst_120 : f32 to vector<8x128xf32>
    %282 = arith.addf %281, %280 : vector<8x128xf32>
    %283 = arith.mulf %238, %282 : vector<8x128xf32>
    %284 = arith.truncf %283 : vector<8x128xf32> to vector<8x128xbf16>
    %c1_121 = arith.constant 1 : index
    %c0_122 = arith.constant 0 : index
    %c0_123 = arith.constant 0 : index
    %285 = vector.load %arg10[%c1_121, %c0_122, %c0_123] : memref<2x128x128xbf16, #tpu.memory_space<vmem>>, vector<1x128x128xbf16>
    %286 = vector.shape_cast %285 : vector<1x128x128xbf16> to vector<128x128xbf16>
    %cst_124 = arith.constant dense<0.000000e+00> : vector<8x128xf32>
    %287 = tpu.matmul %284, %286, %cst_124 {dimension_numbers = #tpu.dot_dimension_numbers<[1], [0], [0], [1], [0, 0, 1, 1], [], []>} : vector<8x128xbf16>, vector<128x128xbf16>, vector<8x128xf32> -> vector<8x128xf32>
    %c1_125 = arith.constant 1 : index
    %c0_126 = arith.constant 0 : index
    %c0_127 = arith.constant 0 : index
    %288 = vector.load %arg11[%c1_125, %c0_126, %c0_127] : memref<2x1x128xf32, #tpu.memory_space<vmem>>, vector<1x1x128xf32>
    %289 = vector.shape_cast %288 : vector<1x1x128xf32> to vector<1x128xf32>
    %290 = vector.broadcast %289 : vector<1x128xf32> to vector<8x128xf32>
    %291 = arith.addf %287, %290 : vector<8x128xf32>
    %cst_128 = arith.constant 5.000000e-01 : f32
    %292 = vector.broadcast %cst_128 : f32 to vector<8x128xf32>
    %293 = arith.mulf %292, %291 : vector<8x128xf32>
    %cst_129 = arith.constant 0.707106769 : f32
    %294 = vector.broadcast %cst_129 : f32 to vector<8x128xf32>
    %295 = arith.mulf %291, %294 : vector<8x128xf32>
    %cst_130 = arith.constant -4.000000e+00 : f32
    %cst_131 = arith.constant 4.000000e+00 : f32
    %296 = vector.broadcast %cst_130 : f32 to vector<8x128xf32>
    %297 = arith.maximumf %296, %295 : vector<8x128xf32>
    %298 = vector.broadcast %cst_131 : f32 to vector<8x128xf32>
    %299 = arith.minimumf %298, %297 : vector<8x128xf32>
    %300 = arith.mulf %299, %299 : vector<8x128xf32>
    %cst_132 = arith.constant -2.72614237E-10 : f32
    %301 = vector.broadcast %cst_132 : f32 to vector<8x128xf32>
    %302 = arith.mulf %300, %301 : vector<8x128xf32>
    %cst_133 = arith.constant 2.77068146E-8 : f32
    %303 = vector.broadcast %cst_133 : f32 to vector<8x128xf32>
    %304 = arith.addf %302, %303 : vector<8x128xf32>
    %305 = arith.mulf %304, %300 : vector<8x128xf32>
    %cst_134 = arith.constant -2.10102394E-6 : f32
    %306 = vector.broadcast %cst_134 : f32 to vector<8x128xf32>
    %307 = arith.addf %305, %306 : vector<8x128xf32>
    %308 = arith.mulf %307, %300 : vector<8x128xf32>
    %cst_135 = arith.constant -5.69250624E-5 : f32
    %309 = vector.broadcast %cst_135 : f32 to vector<8x128xf32>
    %310 = arith.addf %308, %309 : vector<8x128xf32>
    %311 = arith.mulf %310, %300 : vector<8x128xf32>
    %cst_136 = arith.constant -7.34990637E-4 : f32
    %312 = vector.broadcast %cst_136 : f32 to vector<8x128xf32>
    %313 = arith.addf %311, %312 : vector<8x128xf32>
    %314 = arith.mulf %313, %300 : vector<8x128xf32>
    %cst_137 = arith.constant -2.954600e-03 : f32
    %315 = vector.broadcast %cst_137 : f32 to vector<8x128xf32>
    %316 = arith.addf %314, %315 : vector<8x128xf32>
    %317 = arith.mulf %316, %300 : vector<8x128xf32>
    %cst_138 = arith.constant -0.0160960332 : f32
    %318 = vector.broadcast %cst_138 : f32 to vector<8x128xf32>
    %319 = arith.addf %317, %318 : vector<8x128xf32>
    %320 = arith.mulf %319, %299 : vector<8x128xf32>
    %cst_139 = arith.constant -1.45660715E-5 : f32
    %321 = vector.broadcast %cst_139 : f32 to vector<8x128xf32>
    %322 = arith.mulf %300, %321 : vector<8x128xf32>
    %cst_140 = arith.constant -2.13374049E-4 : f32
    %323 = vector.broadcast %cst_140 : f32 to vector<8x128xf32>
    %324 = arith.addf %322, %323 : vector<8x128xf32>
    %325 = arith.mulf %324, %300 : vector<8x128xf32>
    %cst_141 = arith.constant -0.00168282702 : f32
    %326 = vector.broadcast %cst_141 : f32 to vector<8x128xf32>
    %327 = arith.addf %325, %326 : vector<8x128xf32>
    %328 = arith.mulf %327, %300 : vector<8x128xf32>
    %cst_142 = arith.constant -0.00737332925 : f32
    %329 = vector.broadcast %cst_142 : f32 to vector<8x128xf32>
    %330 = arith.addf %328, %329 : vector<8x128xf32>
    %331 = arith.mulf %330, %300 : vector<8x128xf32>
    %cst_143 = arith.constant -0.0142647391 : f32
    %332 = vector.broadcast %cst_143 : f32 to vector<8x128xf32>
    %333 = arith.addf %331, %332 : vector<8x128xf32>
    %334 = tpu.reciprocal %333 {approx = true} : vector<8x128xf32> -> vector<8x128xf32>
    %335 = arith.mulf %320, %334 : vector<8x128xf32>
    %cst_144 = arith.constant 1.000000e+00 : f32
    %336 = vector.broadcast %cst_144 : f32 to vector<8x128xf32>
    %337 = arith.addf %336, %335 : vector<8x128xf32>
    %338 = arith.mulf %293, %337 : vector<8x128xf32>
    %339 = arith.addf %230, %338 : vector<8x128xf32>
    %c0_145 = arith.constant 0 : index
    %c0_146 = arith.constant 0 : index
    %340 = vector.load %arg12[%c0_145, %c0_146] : memref<1x128xf32, #tpu.memory_space<vmem>>, vector<1x128xf32>
    %341 = vector.broadcast %340 : vector<1x128xf32> to vector<8x128xf32>
    %342 = arith.mulf %339, %341 : vector<8x128xf32>
    %cst_147 = arith.constant dense<0.000000e+00> : vector<8xf32>
    %343 = vector.multi_reduction <add>, %342, %cst_147 [1] : vector<8x128xf32> to vector<8xf32>
    %344 = vector.shape_cast %343 : vector<8xf32> to vector<8x1xf32>
    %c0_148 = arith.constant 0 : index
    %c0_149 = arith.constant 0 : index
    %345 = vector.load %arg13[%c0_148, %c0_149] : memref<1x1xf32, #tpu.memory_space<vmem>>, vector<1x1xf32>
    %346 = vector.broadcast %345 : vector<1x1xf32> to vector<8x1xf32>
    %347 = arith.addf %344, %346 : vector<8x1xf32>
    %cst_150 = arith.constant 2.000000e+00 : f32
    %348 = vector.broadcast %cst_150 : f32 to vector<8x64xf32>
    %349 = arith.mulf %348, %69 : vector<8x64xf32>
    %cst_151 = arith.constant 1.000000e+00 : f32
    %350 = vector.broadcast %cst_151 : f32 to vector<8x64xf32>
    %351 = arith.subf %349, %350 : vector<8x64xf32>
    %352 = arith.truncf %351 : vector<8x64xf32> to vector<8x64xbf16>
    %c0_152 = arith.constant 0 : index
    %c0_153 = arith.constant 0 : index
    %353 = vector.load %arg14[%c0_152, %c0_153] : memref<64x64xbf16, #tpu.memory_space<vmem>>, vector<64x64xbf16>
    %cst_154 = arith.constant dense<0.000000e+00> : vector<8x64xf32>
    %354 = tpu.matmul %352, %353, %cst_154 {dimension_numbers = #tpu.dot_dimension_numbers<[1], [0], [0], [1], [0, 0, 1, 1], [], []>} : vector<8x64xbf16>, vector<64x64xbf16>, vector<8x64xf32> -> vector<8x64xf32>
    %355 = arith.mulf %351, %354 : vector<8x64xf32>
    %cst_155 = arith.constant dense<0.000000e+00> : vector<8xf32>
    %356 = vector.multi_reduction <add>, %355, %cst_155 [1] : vector<8x64xf32> to vector<8xf32>
    %357 = vector.shape_cast %356 : vector<8xf32> to vector<8x1xf32>
    %cst_156 = arith.constant 0.000000e+00 : f32
    %358 = vector.broadcast %cst_156 : f32 to vector<8x1xf32>
    %359 = arith.subf %358, %357 : vector<8x1xf32>
    %360 = arith.subf %347, %359 : vector<8x1xf32>
    %c0_157 = arith.constant 0 : index
    %c0_158 = arith.constant 0 : index
    %361 = vector.load %arg15[%c0_157, %c0_158] : memref<8x1xf32, #tpu.memory_space<vmem>>, vector<8x1xf32>
    tpu.vector_store %arg15[%c0_157, %c0_158], %360 {strides = array<i32>} : memref<8x1xf32, #tpu.memory_space<vmem>>, vector<8x1xf32>,
    return
  }
  func.func @transform_0(%arg0: i32) -> (i32, i32) {
    %c0_i32 = arith.constant 0 : i32
    %c0_i32_0 = arith.constant 0 : i32
    return %arg0, %c0_i32 : i32, i32
  }
  func.func @transform_1(%arg0: i32) -> (i32, i32) {
    %c0_i32 = arith.constant 0 : i32
    %c0_i32_0 = arith.constant 0 : i32
    return %arg0, %c0_i32 : i32, i32
  }
  func.func @transform_2(%arg0: i32) -> (i32, i32) {
    %c0_i32 = arith.constant 0 : i32
    %c0_i32_0 = arith.constant 0 : i32
    %c0_i32_1 = arith.constant 0 : i32
    return %c0_i32, %c0_i32_0 : i32, i32
  }
  func.func @transform_3(%arg0: i32) -> (i32, i32) {
    %c0_i32 = arith.constant 0 : i32
    %c0_i32_0 = arith.constant 0 : i32
    %c0_i32_1 = arith.constant 0 : i32
    return %c0_i32, %c0_i32_0 : i32, i32
  }
  func.func @transform_4(%arg0: i32) -> (i32, i32, i32) {
    %c0_i32 = arith.constant 0 : i32
    %c0_i32_0 = arith.constant 0 : i32
    %c0_i32_1 = arith.constant 0 : i32
    %c0_i32_2 = arith.constant 0 : i32
    return %c0_i32, %c0_i32_0, %c0_i32_1 : i32, i32, i32
  }
  func.func @transform_5(%arg0: i32) -> (i32, i32) {
    %c0_i32 = arith.constant 0 : i32
    %c0_i32_0 = arith.constant 0 : i32
    %c0_i32_1 = arith.constant 0 : i32
    return %c0_i32, %c0_i32_0 : i32, i32
  }
  func.func @transform_6(%arg0: i32) -> (i32, i32) {
    %c0_i32 = arith.constant 0 : i32
    %c0_i32_0 = arith.constant 0 : i32
    %c0_i32_1 = arith.constant 0 : i32
    return %c0_i32, %c0_i32_0 : i32, i32
  }
  func.func @transform_7(%arg0: i32) -> (i32, i32) {
    %c0_i32 = arith.constant 0 : i32
    %c0_i32_0 = arith.constant 0 : i32
    %c0_i32_1 = arith.constant 0 : i32
    return %c0_i32, %c0_i32_0 : i32, i32
  }
  func.func @transform_8(%arg0: i32) -> (i32, i32, i32) {
    %c0_i32 = arith.constant 0 : i32
    %c0_i32_0 = arith.constant 0 : i32
    %c0_i32_1 = arith.constant 0 : i32
    %c0_i32_2 = arith.constant 0 : i32
    return %c0_i32, %c0_i32_0, %c0_i32_1 : i32, i32, i32
  }
  func.func @transform_9(%arg0: i32) -> (i32, i32, i32) {
    %c0_i32 = arith.constant 0 : i32
    %c0_i32_0 = arith.constant 0 : i32
    %c0_i32_1 = arith.constant 0 : i32
    %c0_i32_2 = arith.constant 0 : i32
    return %c0_i32, %c0_i32_0, %c0_i32_1 : i32, i32, i32
  }
  func.func @transform_10(%arg0: i32) -> (i32, i32, i32) {
    %c0_i32 = arith.constant 0 : i32
    %c0_i32_0 = arith.constant 0 : i32
    %c0_i32_1 = arith.constant 0 : i32
    %c0_i32_2 = arith.constant 0 : i32
    return %c0_i32, %c0_i32_0, %c0_i32_1 : i32, i32, i32
  }
  func.func @transform_11(%arg0: i32) -> (i32, i32) {
    %c0_i32 = arith.constant 0 : i32
    %c0_i32_0 = arith.constant 0 : i32
    %c0_i32_1 = arith.constant 0 : i32
    return %c0_i32, %c0_i32_0 : i32, i32
  }
  func.func @transform_12(%arg0: i32) -> (i32, i32) {
    %c0_i32 = arith.constant 0 : i32
    %c0_i32_0 = arith.constant 0 : i32
    %c0_i32_1 = arith.constant 0 : i32
    return %c0_i32, %c0_i32_0 : i32, i32
  }
  func.func @transform_13(%arg0: i32) -> (i32, i32) {
    %c0_i32 = arith.constant 0 : i32
    %c0_i32_0 = arith.constant 0 : i32
    %c0_i32_1 = arith.constant 0 : i32
    return %c0_i32, %c0_i32_0 : i32, i32
  }
  func.func @transform_14(%arg0: i32) -> (i32, i32) {
    %c0_i32 = arith.constant 0 : i32
    %c0_i32_0 = arith.constant 0 : i32
    return %arg0, %c0_i32 : i32, i32
  }
}

</mosaic_0001>

<bundles_post_ra>
// kernel: fl_discrete_state_flow_forward.1
= control target key start
LH: loop header
LB: loop body
LE: loop exit
PB: predicated region body
PF: predicated region fallthrough
CT: control target
= control target key end

     0   :  { %s3197_s0 = inlined_call_operand.hbm [shape: s32[16,64], index: 0, kind: input, shape index: {}]   ;;  %s3198_s1 = inlined_call_operand.vmem [shape: f32[16,128], index: 1, kind: input, shape index: {}]   ;;  %s3199_s2 = inlined_call_operand.hbm [shape: bf16[128,128], index: 2, kind: input, shape index: {}]   ;;  %s3200_s3 = inlined_call_operand.hbm [shape: bf16[128,128], index: 3, kind: input, shape index: {}]   ;;  %s3201_s4 = inlined_call_operand.hbm [shape: f32[2,1,128], index: 4, kind: input, shape index: {}]   ;;  %s3202_s5 = inlined_call_operand.vmem [shape: bf16[64,128], index: 5, kind: input, shape index: {}]   ;;  %s3203_s6 = inlined_call_operand.hbm [shape: bf16[128,384], index: 6, kind: input, shape index: {}]   ;;  %s3204_s7 = inlined_call_operand.hbm [shape: f32[1,384], index: 7, kind: input, shape index: {}]   ;;  %s3205_s8 = inlined_call_operand.hbm [shape: bf16[2,128,128], index: 8, kind: input, shape index: {}]   ;;  %s3206_s9 = inlined_call_operand.hbm [shape: bf16[2,128,128], index: 9, kind: input, shape index: {}]   ;;  %s3207_s10 = inlined_call_operand.hbm [shape: f32[2,1,128], index: 10, kind: input, shape index: {}]   ;;  %s3208_s11 = inlined_call_operand.hbm [shape: f32[1,128], index: 11, kind: input, shape index: {}]   ;;  %s3209_s12 = inlined_call_operand.<no memory space> [shape: f32[1,1], index: 12, kind: input, shape index: {}]   ;;  %s3210_s13 = inlined_call_operand.hbm [shape: bf16[64,64], index: 13, kind: input, shape index: {}]   ;;  %s3211_s14 = inlined_call_operand.vmem [shape: f32[16,1], index: 14, kind: output, shape index: {}]  }
   0x1   :  { %3219 = sst [smem:[#allocation26_spill]] %s3198_s1  ;;  %v19_v0 = vstv %s3209_s12 }
   0x2   :  { %3220 = sst [smem:[#allocation27_spill]] %s3199_s2  ;;  %20 = vst [vmem:[#allocation2] sm:$0x1] %v19_v0 }
   0x3   :  { %3221 = sst [smem:[#allocation28_spill]] %s3200_s3 }
   0x4   :  { %3222 = sst [smem:[#allocation29_spill]] %s3201_s4 }
   0x5   :  { %3223 = sst [smem:[#allocation30_spill]] %s3202_s5 }
   0x6   :  { %3224 = sst [smem:[#allocation31_spill]] %s3211_s14 }
   0x7   :  { %21 = vsyncpa [#allocation4], 0 }
   0x8   :  { %23 = vsyncpa [#allocation4 + $0x1], 0 }
   0x9   :  { %24 = vsyncpa [#allocation6], 0 }
   0xa   :  { %25 = vsyncpa [#allocation9], 0 }
   0xb   :  { %26 = vsyncpa [#allocation12], 0 }
   0xc   :  { %27 = vsyncpa [#allocation15], 0 }
   0xd   :  { %28 = vsyncpa [#allocation18], 0  ;;  %s2924_s15 = smov 0   ;;  %s2926_s16 = smov 0  }
   0xe   :  { %s2928_s17 = smov 0   ;;  %s2930_s18 = smov 0  }
   0xf LB: > { %s3225_s2 = sld [smem:[#allocation27_spill]]  ;;  %s2948_s21 = sadd.s32 4294967295, %s2828_s18   ;;  %s2828_s18 = sphi %s2930_s18, %s3242_s18   ;;  %s2824_s17 = sphi %s2928_s17, %s3241_s17   ;;  %s2820_s16 = sphi %s2926_s16, %s3240_s16   ;;  %s2816_s15 = sphi %s2924_s15, %s3239_s15  }
  0x10   : > { %p1841_p0 = scmp.ge.s32.totalorder %s2828_s18, 1  ;;  %p55_p1 = scmp.eq.s32.totalorder %s2948_s21, 0 }
  0x11   : > { %p369_p2 = scmp.lt.s32.totalorder %s2828_s18, 3  ;;  %s2830_s23 = smov [#allocation5]  }
  0x12   : > { %s382_s24 = sshll.u32 %s2830_s23, 4  ;;  %s3227_s4 = sld [smem:[#allocation29_spill]]  ;;  %s383_s24 = int_to_ptr.vmem [resolvable:$true] %s382_s24 }
  0x13   : > { %p2953_p3 = pnand %p1841_p0, %p369_p2  ;;  %s2831_s29 = smov [#allocation8]  }
  0x14   : > { %s410_s30 = sshll.u32 %s2831_s29, 4  ;;  %s3213_s12 = smov 64   ;;  %s411_s30 = int_to_ptr.vmem [resolvable:$true] %s410_s30 }
  0x15   : > { %s380_s20 = sshll.u32 %s3225_s2, 4  ;;  %p2322_p4 = pneg %p2953_p3  ;;  %s381_s20 = int_to_ptr.hbm [resolvable:$true] %s380_s20 }
  0x16   : > { %s3215_s19 = smov 4   ;;  %s3217_s23 = smov 16  }
  0x17   : > { %p2964_p5 = pnand %p2322_p4, %p55_p1  ;;  %s3218_s25 = smov 1  }
  0x18   : > { %s408_s27 = sshll.u32 %s3227_s4, 4  ;;  %s440_s29 = sshll.u32 %s3204_s7, 4  ;;  %s409_s27 = int_to_ptr.hbm [resolvable:$true] %s408_s27  ;;  %s441_s29 = int_to_ptr.hbm [resolvable:$true] %s440_s29 }
  0x19   : > { %2325 = dma.hbm_to_vmem [thread:$0]  (!%p2964_p5), %s381_s20, 1024, %s383_s24, [#allocation6], %s3213_s12, %s3213_s12, %s3215_s19  }
  0x1a   : > { %2331 = dma.hbm_to_vmem [thread:$0]  (!%p2964_p5), %s409_s27, 32, %s411_s30, [#allocation9], %s3217_s23, %s3217_s23, %s3218_s25  }
  0x1b   : > { %s2836_s4 = smov [#allocation11]   ;;  %s465_s24 = sshll.u32 %s3206_s9, 4  ;;  %s466_s24 = int_to_ptr.hbm [resolvable:$true] %s465_s24 }
  0x1c   : > { %s442_s14 = sshll.u32 %s2836_s4, 4  ;;  %s2837_s12 = smov [#allocation14]   ;;  %s443_s14 = int_to_ptr.vmem [resolvable:$true] %s442_s14 }
  0x1d   : > { %2337 = dma.hbm_to_vmem [thread:$0]  (!%p2964_p5), %s441_s29, 48, %s443_s14, [#allocation12]  }
  0x1e   : > { %s467_s19 = sshll.u32 %s2837_s12, 4  ;;  %s494_s2 = sshll.u32 %s3208_s11, 4  ;;  %s468_s19 = int_to_ptr.vmem [resolvable:$true] %s467_s19  ;;  %s495_s2 = int_to_ptr.hbm [resolvable:$true] %s494_s2 }
  0x1f   : > { %s3229_s4 = smov 4   ;;  %s3230_s30 = smov 64  }
  0x20   : > { %2343 = dma.hbm_to_vmem [thread:$0]  (!%p2964_p5), %s466_s24, 2048, %s468_s19, [#allocation15], %s3230_s30, %s3230_s30, %s3229_s4  }
  0x21   : > { %s3231_s3 = sld [smem:[#allocation28_spill]]  ;;  %s2838_s14 = smov [#allocation17]  }
  0x22   : > { %s496_s29 = sshll.u32 %s2838_s14, 4  ;;  %s2839_s1 = smov [#allocation7]   ;;  %s497_s29 = int_to_ptr.vmem [resolvable:$true] %s496_s29 }
  0x23   : > { %2349 = dma.hbm_to_vmem [thread:$0]  (!%p2964_p5), %s495_s2, 16, %s497_s29, [#allocation18]  }
  0x24   : > { %s396_s12 = sshll.u32 %s2839_s1, 4  ;;  %s425_s25 = sshll.u32 %s3203_s6, 4  ;;  %s397_s12 = int_to_ptr.vmem [resolvable:$true] %s396_s12  ;;  %s426_s25 = int_to_ptr.hbm [resolvable:$true] %s425_s25 }
  0x25   : > { %s2840_s19 = smov [#allocation10]   ;;  %s451_s2 = sshll.u32 %s3205_s8, 4  ;;  %s452_s2 = int_to_ptr.hbm [resolvable:$true] %s451_s2 }
  0x26   : > { %s427_s24 = sshll.u32 %s2840_s19, 4  ;;  %s2841_s14 = smov 192   ;;  %s428_s24 = int_to_ptr.vmem [resolvable:$true] %s427_s24 }
  0x27   : > { %s394_s20 = sshll.u32 %s3231_s3, 4  ;;  %s2842_s29 = smov 12   ;;  %s395_s20 = int_to_ptr.hbm [resolvable:$true] %s394_s20 }
  0x28   : > { %2328 = dma.hbm_to_vmem [thread:$0]  (!%p2964_p5), %s395_s20, 1024, %s397_s12, [#allocation6], %s3230_s30, %s3230_s30, %s3229_s4  }
  0x29   : > { %2334 = dma.hbm_to_vmem [thread:$0]  (!%p2964_p5), %s426_s25, 3072, %s428_s24, [#allocation9], %s2841_s14, %s2841_s14, %s2842_s29  }
  0x2a   : > { %s2843_s23 = smov [#allocation13]   ;;  %s479_s20 = sshll.u32 %s3207_s10, 4  ;;  %s480_s20 = int_to_ptr.hbm [resolvable:$true] %s479_s20 }
  0x2b   : > { %s453_s1 = sshll.u32 %s2843_s23, 4  ;;  %s508_s19 = sshll.u32 %s3210_s13, 4  ;;  %s454_s1 = int_to_ptr.vmem [resolvable:$true] %s453_s1  ;;  %s509_s19 = int_to_ptr.hbm [resolvable:$true] %s508_s19 }
  0x2c   : > { %2340 = dma.hbm_to_vmem [thread:$0]  (!%p2964_p5), %s452_s2, 2048, %s454_s1, [#allocation12], %s3230_s30, %s3230_s30, %s3229_s4  }
  0x2d   : > { %s2844_s3 = smov [#allocation16]   ;;  %s3232_s26 = smov 1  }
  0x2e   : > { %s481_s24 = sshll.u32 %s2844_s3, 4  ;;  %s3233_s5 = smov 16   ;;  %s482_s24 = int_to_ptr.vmem [resolvable:$true] %s481_s24 }
  0x2f   : > { %2346 = dma.hbm_to_vmem [thread:$0]  (!%p2964_p5), %s480_s20, 32, %s482_s24, [#allocation15], %s3233_s5, %s3233_s5, %s3232_s26  }
  0x30   : > { %s2845_s2 = smov [#allocation19]   ;;  %s3034_s29 = sadd.s32 1, %s2828_s18  }
  0x31   : > { %s510_s14 = sshll.u32 %s2845_s2, 4  ;;  %s38_s23 = ssub.s32 %s2828_s18, %s3034_s29  ;;  %s511_s14 = int_to_ptr.vmem [resolvable:$true] %s510_s14 }
  0x32   : > { %2352 = dma.hbm_to_vmem [thread:$0]  (!%p2964_p5), %s509_s19, 512, %s511_s14, [#allocation18], %s3230_s30, %s3230_s30, %s3229_s4  }
  0x33   : > { %s41_s1 = sadd.s32 1, %s2824_s17  ;;  %p39_p6 = scmp.eq.s32.totalorder %s38_s23, 0 }
  0x34   : > { %p48_p7 = scmp.ne.s32.totalorder %s2824_s17, %s2820_s16  ;;  %p49_p8 = scmp.eq.s32.totalorder %s2828_s18, 0 }
  0x35   : > { %p54_p9 = scmp.ne.s32.totalorder %s2820_s16, %s2816_s15  ;;  %p2367_p11 = scmp.lt.s32.totalorder %s2828_s18, 2 }
  0x36   : > { %s3045_s27 = scalar_select %p39_p6, %s2824_s17, %s41_s1  }
  0x37   : > { %p3049_p10 = por %p55_p1, %p54_p9  ;;  %s524_s28 = sand.u32 1, %s2824_s17  }
  0x38   : > { %s1854_s25 = sshll.u32 %s2828_s18, 3  ;;  %p50_p12 = por %p49_p8, %p48_p7 }
  0x39   : > { %s1853_s4 = sshll.u32 %s524_s28, 3  ;;  %s532_s19 = scalar_lea.hbm %s3197_s0, %s1854_s25 }
  0x3a   : > { %s534_s3 = sshll.u32 %s532_s19, 4  ;;  %s528_s24 = scalar_lea.vmem [#allocation3], %s1853_s4  ;;  %s535_s3 = int_to_ptr.hbm [resolvable:$true] %s534_s3 }
  0x3b   : > { %s536_s26 = sshll.u32 %s528_s24, 4  ;;  %p3059_p13 = pnand %p2367_p11, %p50_p12  ;;  %s537_s26 = int_to_ptr.vmem [resolvable:$true] %s536_s26 }
  0x3c   : > { %s525_s5 = scalar_lea.sflag [#allocation4], %s524_s28  ;;  %s2744_s2 = sshra.s32 %s535_s3, 4  ;;  %s2745_s2 = int_to_ptr.hbm [resolvable:$true] %s2744_s2 }
  0x3d   : > { %s2746_s18 = scalar_lea.hbm %s2745_s2, 8  ;;  %p2748_p2 = pneg %p3059_p13 }
  0x3e   : > { %p2747_p0 = scmp.ne.s32.totalorder %s2745_s2, %s2746_s18  ;;  %s2751_s1 = scalar_lea.hbm %s3197_s0, 16 }
  0x3f   : > { %p2752_p6 = scmp.lt.s32.totalorder %s2745_s2, %s3197_s0  ;;  %p2753_p7 = scmp.lt.s32.totalorder %s2751_s1, %s2746_s18 }
  0x40   : > { %p2749_p4 = pnand %p2748_p2, %p2747_p0 }
  0x41   : > { %p2754_p8 = por %p2753_p7, %p2752_p6 }
  0x42   : > { %p2750_p5 = pneg %p2749_p4 }
  0x44   : > { %p2755_p9 = pnand %p2754_p8, %p2750_p5 }
  0x46   : > { %2758 = shalt.err (!%p2755_p9)
}
  0x47   : > { %2356 = dma.hbm_to_vmem [thread:$0]  (!%p3059_p13), %s535_s3, 128, %s537_s26, %s525_s5  }
  0x48   : > { %552 = sbr.rel (%p2953_p3) target bundleno = 1411 (0x583), region = 76  ;;  %s554_s28 = sand.u32 (!%p2953_p3), 1, %s2820_s16  }
  0x49   : > { %s3076_s30 = sshll.u32 (!%p2953_p3), %s554_s28, 3  ;;  %s555_s12 = scalar_lea.sflag (!%p2953_p3), [#allocation4], %s554_s28 }
  0x4a   : > { %s558_s19 = scalar_lea.vmem (!%p2953_p3), [#allocation3], %s3076_s30 }
  0x4d   : > { %2791 = dma.done.wait (%p3049_p10), %s555_s12, 128  }
  0x4e   : > { %2793 = vsyncadd (%p3049_p10), %s555_s12, 4294967168 }
  0x4f   : > { %2795 = dma.done.wait (%p55_p1), [#allocation6], 2048  }
  0x50   : > { %2797 = vsyncadd (%p55_p1), [#allocation6], 4294965248 }
  0x51   : > { %2799 = dma.done.wait (%p55_p1), [#allocation9], 3104  }
  0x52   : > { %2801 = vsyncadd (%p55_p1), [#allocation9], 4294964192 }
  0x53   : > { %2803 = dma.done.wait (%p55_p1), [#allocation12], 2096  }
  0x54   : > { %2805 = vsyncadd (%p55_p1), [#allocation12], 4294965200 }
  0x55   : > { %2807 = dma.done.wait (%p55_p1), [#allocation15], 2080  }
  0x56   : > { %2809 = vsyncadd (%p55_p1), [#allocation15], 4294965216 }
  0x57   : > { %2811 = dma.done.wait (%p55_p1), [#allocation18], 528  }
  0x58   : > { %2813 = vsyncadd (%p55_p1), [#allocation18], 4294966768  ;;  %v2207_v1 = vld [vmem:[#allocation5 + $0x38] sm:$0xff]  ;;  %v2206_v2 = vld [vmem:[#allocation5 + $0x30] sm:$0xff]  ;;  %p657_p3 = scmp.lt.s32.totalorder %s2948_s21, 1  ;;  %s3236_s24 = sld [smem:[#allocation26_spill]] }
  0x59   : > { %736 = vmatpush.bf16.msra.mxu0 %v2207_v1  ;;  %v2205_v3 = vld [vmem:[#allocation5 + $0x28] sm:$0xff]  ;;  %v2204_v4 = vld [vmem:[#allocation5 + $0x20] sm:$0xff]  ;;  %v2203_v5 = vld [vmem:[#allocation5 + $0x18] sm:$0xff]  ;;  %s3237_s2 = sld [smem:[#allocation30_spill]]  ;;  %vm1105_vm0 = vcmask 523264   ;;  %vm1666_vm1 = vcmask 7168  }
  0x5a   : > { %s3244_s21 = smov (!%p657_p3, %s2948_s21), 1  ;;  %v2202_v6 = vld [vmem:[#allocation5 + $0x10] sm:$0xff]  ;;  %v2201_v7 = vld [vmem:[#allocation5 + $0x8] sm:$0xff]  ;;  %v2200_v8 = vld [vmem:[#allocation5] sm:$0xff]  ;;  %s3238_s12 = sld [smem:[#allocation31_spill]] }
  0x5b   : > { %s1867_s22 = sshll.u32 %s3244_s21, 3  ;;  %v2215_v11 = vld [vmem:[#allocation7 + $0x38] sm:$0xff]  ;;  %v2214_v12 = vld [vmem:[#allocation7 + $0x30] sm:$0xff]  ;;  %v2213_v13 = vld [vmem:[#allocation7 + $0x28] sm:$0xff] }
  0x5c   : > { %849 = vmatpush.bf16.msra.mxu1 %v2215_v11  ;;  %v2212_v14 = vld [vmem:[#allocation7 + $0x20] sm:$0xff]  ;;  %v2211_v15 = vld [vmem:[#allocation7 + $0x18] sm:$0xff]  ;;  %v2210_v17 = vld [vmem:[#allocation7 + $0x10] sm:$0xff] }
  0x5d   : > { %737 = vmatpush.bf16.msra.mxu0 %v2206_v2  ;;  %v2426_v16 = vld [vmem:[#allocation8] ss:$0 sm:$0xff]  ;;  %v2209_v20 = vld [vmem:[#allocation7 + $0x8] sm:$0xff]  ;;  %v2238_v31 = vld [vmem:[#allocation10 + $0xb0] sm:$0xf0] }
  0x5e   : > { %s660_s26 = scalar_lea.vmem %s3236_s24, %s1867_s22  ;;  %v2208_v22 = vld [vmem:[#allocation7] sm:$0xff]  ;;  %v2020_v30 = vld [vmem:[#allocation10 + $0xa8] sm:$0xf]  ;;  %v2237_v32 = vld [vmem:[#allocation10 + $0xac] sm:$0xf] }
  0x5f   : > { %v666_v9 = vld [vmem:[%s660_s26] sm:$0xff]  ;;  %v2022_v33 = vld [vmem:[#allocation10 + $0xb4] sm:$0xf0]  ;;  %v2021_v36 = vor.u32 %v2238_v31, %v2020_v30  ;;  %v2239_v39 = vld [vmem:[#allocation10 + $0xb8] sm:$0xf0] }
  0x60   : > { %v667_v10 = vpack.c.bf16 %v666_v9, %v666_v9  ;;  %850 = vmatpush.bf16.msra.mxu1 %v2214_v12  ;;  %v2025_v37 = vor.u32 %v2237_v32, %v2022_v33  ;;  %v2028_v38 = vld [vmem:[#allocation10 + $0xb0] sm:$0xf]  ;;  %v2235_v42 = vld [vmem:[#allocation10 + $0x98] sm:$0xf0]  ;;  %v2234_v43 = vld [vmem:[#allocation10 + $0x94] sm:$0xf] }
  0x61   : > { %738 = vmatpush.bf16.msra.mxu0 %v2205_v3  ;;  %v2008_v40 = vld [vmem:[#allocation10 + $0x90] sm:$0xf]  ;;  %v2029_v41 = vor.u32 %v2239_v39, %v2028_v38  ;;  %v2010_v44 = vld [vmem:[#allocation10 + $0x9c] sm:$0xf0]  ;;  %1031 = vmatpush.bf16.msra.mxu2 %v2021_v36  ;;  %v2016_v49 = vld [vmem:[#allocation10 + $0x98] sm:$0xf] }
  0x62   : > { %1044 = vmatpush.bf16.msra.mxu3 %v2025_v37  ;;  %v2009_v47 = vor.u32 %v2235_v42, %v2008_v40  ;;  %v2013_v48 = vor.u32 %v2234_v43, %v2010_v44  ;;  %v2236_v50 = vld [vmem:[#allocation10 + $0xa0] sm:$0xf0]  ;;  %v1996_v51 = vld [vmem:[#allocation10 + $0x78] sm:$0xf]  ;;  %v2231_v56 = vld [vmem:[#allocation10 + $0x7c] sm:$0xf] }
  0x63   : > { %v2232_v52 = vld [vmem:[#allocation10 + $0x80] sm:$0xf0]  ;;  %v2017_v55 = vor.u32 %v2236_v50, %v2016_v49  ;;  %v1998_v57 = vld [vmem:[#allocation10 + $0x84] sm:$0xf0]  ;;  %v2004_v58 = vld [vmem:[#allocation10 + $0x80] sm:$0xf] }
  0x64   : > { %851 = vmatpush.bf16.msra.mxu1 %v2213_v13  ;;  %v2233_v59 = vld [vmem:[#allocation10 + $0x88] sm:$0xf0]  ;;  %v1997_v62 = vor.u32 %v2232_v52, %v1996_v51  ;;  %v2001_v63 = vor.u32 %v2231_v56, %v1998_v57  ;;  %v1984_v0 = vld [vmem:[#allocation10 + $0x60] sm:$0xf]  ;;  %v2228_v3 = vld [vmem:[#allocation10 + $0x64] sm:$0xf] }
  0x65   : > { %739 = vmatpush.bf16.msra.mxu0 %v2204_v4  ;;  %1032 = vmatpush.bf16.msra.mxu2 %v2009_v47  ;;  %v2005_v1 = vor.u32 %v2233_v59, %v2004_v58  ;;  %v2229_v2 = vld [vmem:[#allocation10 + $0x68] sm:$0xf0]  ;;  %v1986_v4 = vld [vmem:[#allocation10 + $0x6c] sm:$0xf0]  ;;  %v1972_v9 = vld [vmem:[#allocation10 + $0x48] sm:$0xf] }
  0x66   : > { %1045 = vmatpush.bf16.msra.mxu3 %v2013_v48  ;;  %v1985_v11 = vor.u32 %v2229_v2, %v1984_v0  ;;  %v1989_v12 = vor.u32 %v2228_v3, %v1986_v4  ;;  %v2226_v13 = vld [vmem:[#allocation10 + $0x50] sm:$0xf0]  ;;  %v2223_v31 = vld [vmem:[#allocation10 + $0x38] sm:$0xf0]  ;;  %v1962_v33 = vld [vmem:[#allocation10 + $0x3c] sm:$0xf0] }
  0x67   : > { %v2222_v32 = vld [vmem:[#allocation10 + $0x34] sm:$0xf]  ;;  %v2224_v36 = vld [vmem:[#allocation10 + $0x40] sm:$0xf0]  ;;  %v2219_v44 = vld [vmem:[#allocation10 + $0x1c] sm:$0xf] }
  0x68   : > { %852 = vmatpush.bf16.msra.mxu1 %v2212_v14  ;;  %v2243_v14 = vld [vmem:[%s3237_s2 + $0x18] sm:$0xff]  ;;  %v2241_v37 = vld [vmem:[%s3237_s2 + $0x8] sm:$0xff]  ;;  %v1965_v40 = vor.u32 %v2222_v32, %v1962_v33  ;;  %v1936_v56 = vld [vmem:[#allocation10] sm:$0xf] }
  0x69   : > { %740 = vmatpush.bf16.msra.mxu0 %v2203_v5  ;;  %1033 = vmatpush.bf16.msra.mxu2 %v1997_v62  ;;  %v2220_v43 = vld [vmem:[#allocation10 + $0x20] sm:$0xf0]  ;;  %v2221_v47 = vld [vmem:[#allocation10 + $0x28] sm:$0xf0]  ;;  %v2218_v62 = vld [vmem:[#allocation10 + $0x10] sm:$0xf0] }
  0x6a   : > { %1046 = vmatpush.bf16.msra.mxu3 %v2001_v63  ;;  %v2217_v57 = vld [vmem:[#allocation10 + $0x8] sm:$0xf0]  ;;  %v2216_v58 = vld [vmem:[#allocation10 + $0x4] sm:$0xf]  ;;  %v2427_v4 = vld [vmem:[#allocation8 + $0x1] ss:$0 sm:$0xff] }
  0x6b   : > { %v1937_v59 = vor.u32 %v2217_v57, %v1936_v56 }
  0x6c   : > { %853 = vmatpush.bf16.msra.mxu1 %v2211_v15 }
  0x6d   : > { %741 = vmatpush.bf16.msra.mxu0 %v2202_v6  ;;  %1034 = vmatpush.bf16.msra.mxu2 %v1985_v11  ;;  %v2251_v11 = vld [vmem:[#allocation13 + $0x38] sm:$0xff] }
  0x6e   : > { %1047 = vmatpush.bf16.msra.mxu3 %v1989_v12  ;;  %v2250_v12 = vld [vmem:[#allocation13 + $0x30] sm:$0xff] }
  0x70   : > { %854 = vmatpush.bf16.msra.mxu1 %v2210_v17  ;;  %v2225_v17 = vld [vmem:[#allocation10 + $0x4c] sm:$0xf] }
  0x71   : > { %742 = vmatpush.bf16.msra.mxu0 %v2201_v7  ;;  %v1992_v7 = vld [vmem:[#allocation10 + $0x68] sm:$0xf] }
  0x74   : > { %855 = vmatpush.bf16.msra.mxu1 %v2209_v20 }
  0x75   : > { %743 = vmatpush.bf16.msra.mxu0 %v2200_v8  ;;  %v2230_v8 = vld [vmem:[#allocation10 + $0x70] sm:$0xf0] }
  0x78   : > { %744 = vmatmul.bf16.vlgmr.msra.gmra.mxu0 %v667_v10  ;;  %856 = vmatpush.bf16.msra.mxu1 %v2208_v22  ;;  %v2227_v22 = vld [vmem:[#allocation10 + $0x58] sm:$0xf0] }
  0x79   : > { %1057 = vmatpush.bf16.msrb.mxu0 %v2029_v41  ;;  %v1948_v41 = vld [vmem:[#allocation10 + $0x18] sm:$0xf] }
  0x7a   : > { %v1949_v50 = vor.u32 %v2220_v43, %v1948_v41 }
  0x7c   : > { %1113 = vmatpush.bf16.msrb.mxu1 %v2243_v14  ;;  %v2248_v14 = vld [vmem:[#allocation13 + $0x20] sm:$0xff] }
  0x7d   : > { %1058 = vmatpush.bf16.msrb.mxu0 %v2017_v55 }
  0x81   : > { %1059 = vmatpush.bf16.msrb.mxu0 %v2005_v1  ;;  %v1070_v1 = vld [vmem:[%s558_s19] sm:$0xff]  ;;  %s664_s19 = scalar_lea.vmem %s3238_s12, %s1867_s22 }
  0x82   : > { %v3148_v2 = vcvt.s32.f32 %v1070_v1 }
  0x84   : > { %v1072_v3 = vpack.c.bf16 %v3148_v2, %v3148_v2 }
  0xf5   : > { %v745_v18 = vpop.f32.mrf.mxu0 }
  0xf6   : > { %v3113_v19 = vadd.f32 %v2426_v16, %v745_v18  ;;  %v1993_v16 = vor.u32 %v2230_v8, %v1992_v7  ;;  %v1974_v18 = vld [vmem:[#allocation10 + $0x54] sm:$0xf0] }
  0xf8   : > { %v750_v21 = vmul.f32 0.70710677, %v3113_v19  ;;  %1060 = vmatpush.bf16.msrb.mxu0 %v1993_v16  ;;  %v3155_v16 = vld [vmem:[#allocation11] sm:$0x7] }
  0xfa   : > { %v3116_v23 = vclamps-f32 %v750_v21, 4.0  ;;  %v1980_v21 = vld [vmem:[#allocation10 + $0x50] sm:$0xf] }
  0xfb   : > { %v1981_v30 = vor.u32 %v2227_v22, %v1980_v21 }
  0xfc   : > { %v3120_v24 = vmul.f32 %v3116_v23, %v3116_v23 }
  0xfd   : > { %v747_v25 = vpop.f32.mrf.mxu0  ;;  %1061 = vmatpush.bf16.msrb.mxu0 %v1981_v30 }
  0xfe   : > { %v754_v26 = vmul.f32 -2.7261424e-10, %v3120_v24  ;;  %v767_v27 = vmul.f32 -1.45660715e-05, %v3120_v24  ;;  %v2242_v25 = vld [vmem:[%s3237_s2 + $0x10] sm:$0xff] }
  0xff   : > { %1114 = vmatpush.bf16.msrb.mxu1 %v2242_v25  ;;  %v2246_v25 = vld [vmem:[#allocation13 + $0x10] sm:$0xff] }
 0x100   : > { %v755_v28 = vadd.f32 2.7706815e-08, %v754_v26  ;;  %v768_v29 = vadd.f32 -0.00021337405, %v767_v27  ;;  %v1973_v27 = vor.u32 %v2226_v13, %v1972_v9  ;;  %v2249_v13 = vld [vmem:[#allocation13 + $0x28] sm:$0xff] }
 0x102   : > { %v756_v34 = vmul.f32 %v755_v28, %v3120_v24  ;;  %v769_v35 = vmul.f32 %v768_v29, %v3120_v24  ;;  %v1977_v28 = vor.u32 %v2225_v17, %v1974_v18  ;;  %v1960_v29 = vld [vmem:[#allocation10 + $0x30] sm:$0xf]  ;;  %1035 = vmatpush.bf16.msra.mxu2 %v1973_v27  ;;  %v897_v17 = vperm.slane %v3155_v16, 0  ;;  %v2247_v18 = vld [vmem:[#allocation13 + $0x18] sm:$0xff] }
 0x103   : > { %v1961_v39 = vor.u32 %v2223_v31, %v1960_v29  ;;  %1115 = vmatpush.bf16.msrb.mxu1 %v2241_v37  ;;  %v2244_v31 = vld [vmem:[#allocation13] sm:$0xff] }
 0x104   : > { %v757_v45 = vadd.f32 -2.101024e-06, %v756_v34  ;;  %v770_v46 = vadd.f32 -0.001682827, %v769_v35  ;;  %v1968_v35 = vld [vmem:[#allocation10 + $0x38] sm:$0xf]  ;;  %1048 = vmatpush.bf16.msra.mxu3 %v1977_v28 }
 0x105   : > { %v1969_v42 = vor.u32 %v2224_v36, %v1968_v35  ;;  %v2245_v28 = vld [vmem:[#allocation13 + $0x8] sm:$0xff] }
 0x106   : > { %v758_v53 = vmul.f32 %v757_v45, %v3120_v24  ;;  %v771_v54 = vmul.f32 %v770_v46, %v3120_v24  ;;  %v1950_v45 = vld [vmem:[#allocation10 + $0x24] sm:$0xf0]  ;;  %v1956_v46 = vld [vmem:[#allocation10 + $0x20] sm:$0xf]  ;;  %1036 = vmatpush.bf16.msra.mxu2 %v1961_v39 }
 0x107   : > { %v1953_v51 = vor.u32 %v2219_v44, %v1950_v45  ;;  %1062 = vmatpush.bf16.msrb.mxu0 %v1969_v42  ;;  %v1957_v52 = vor.u32 %v2221_v47, %v1956_v46 }
 0x108   : > { %v759_v60 = vadd.f32 -5.6925062e-05, %v758_v53  ;;  %v772_v61 = vadd.f32 -0.0073733293, %v771_v54  ;;  %1049 = vmatpush.bf16.msra.mxu3 %v1965_v40  ;;  %v749_v53 = vmul.f32 0.5, %v3113_v19  ;;  %v2240_v19 = vld [vmem:[%s3237_s2] sm:$0xff] }
 0x109   : > { %1116 = vmatpush.bf16.msrb.mxu1 %v2240_v19  ;;  %v2255_v19 = vld [vmem:[#allocation14 + $0x18] sm:$0xff] }
 0x10a   : > { %v760_v5 = vmul.f32 %v759_v60, %v3120_v24  ;;  %v773_v6 = vmul.f32 %v772_v61, %v3120_v24  ;;  %1037 = vmatpush.bf16.msra.mxu2 %v1949_v50  ;;  %v1938_v60 = vld [vmem:[#allocation10 + $0xc] sm:$0xf0]  ;;  %v1944_v61 = vld [vmem:[#allocation10 + $0x8] sm:$0xf] }
 0x10b   : > { %1063 = vmatpush.bf16.msrb.mxu0 %v1957_v52  ;;  %v1941_v63 = vor.u32 %v2216_v58, %v1938_v60  ;;  %v1945_v0 = vor.u32 %v2218_v62, %v1944_v61  ;;  %v2259_v60 = vld [vmem:[#allocation14 + $0x38] sm:$0xff]  ;;  %v2258_v61 = vld [vmem:[#allocation14 + $0x30] sm:$0xff]  ;;  %v2257_v62 = vld [vmem:[#allocation14 + $0x28] sm:$0xff] }
 0x10c   : > { %v761_v10 = vadd.f32 -0.00073499064, %v760_v5  ;;  %v774_v15 = vadd.f32 -0.014264739, %v773_v6  ;;  %1050 = vmatpush.bf16.msra.mxu3 %v1953_v51 }
 0x10e   : > { %v762_v20 = vmul.f32 %v761_v10, %v3120_v24  ;;  %2432 = vrcp.f32 %v774_v15  ;;  %1038 = vmatpush.bf16.msra.mxu2 %v1937_v59 }
 0x10f   : > { %1064 = vmatpush.bf16.msrb.mxu0 %v1945_v0  ;;  %v898_v0 = vperm.slane %v3155_v16, 1 }
 0x110   : > { %v763_v26 = vadd.f32 -0.0029546, %v762_v20  ;;  %1051 = vmatpush.bf16.msra.mxu3 %v1941_v63  ;;  %v2256_v63 = vld [vmem:[#allocation14 + $0x20] sm:$0xff] }
 0x112   : > { %v764_v34 = vmul.f32 %v763_v26, %v3120_v24  ;;  %1217 = vmatpush.bf16.msrb.mxu2 %v2251_v11 }
 0x114   : > { %v765_v38 = vadd.f32 -0.016096033, %v764_v34  ;;  %v2433_v48 = vpop.eup %2432  ;;  %1329 = vmatpush.bf16.msrb.mxu3 %v2259_v60 }
 0x116   : > { %v766_v24 = vmul.f32 %v3116_v23, %v765_v38  ;;  %1218 = vmatpush.bf16.msrb.mxu2 %v2250_v12 }
 0x118   : > { %v776_v49 = vmul.f32 %v2433_v48, %v766_v24  ;;  %1330 = vmatpush.bf16.msrb.mxu3 %v2258_v61 }
 0x11a   : > { %v777_v54 = vadd.f32 1.0, %v776_v49  ;;  %1219 = vmatpush.bf16.msrb.mxu2 %v2249_v13 }
 0x11c   : > { %v778_v55 = vmul.f32 %v777_v54, %v749_v53  ;;  %1331 = vmatpush.bf16.msrb.mxu3 %v2257_v62 }
 0x11e   : > { %v779_v23 = vpack.c.bf16 %v778_v55, %v778_v55  ;;  %1220 = vmatpush.bf16.msrb.mxu2 %v2248_v14 }
 0x120   : > { %857 = vmatmul.bf16.vlgmr.msra.gmra.mxu1 %v779_v23  ;;  %1332 = vmatpush.bf16.msrb.mxu3 %v2256_v63 }
 0x122   : > { %1221 = vmatpush.bf16.msrb.mxu2 %v2247_v18 }
 0x124   : > { %1333 = vmatpush.bf16.msrb.mxu3 %v2255_v19 }
 0x126   : > { %1222 = vmatpush.bf16.msrb.mxu2 %v2246_v25 }
 0x12a   : > { %1223 = vmatpush.bf16.msrb.mxu2 %v2245_v28 }
 0x12e   : > { %1224 = vmatpush.bf16.msrb.mxu2 %v2244_v31 }
 0x130   : > { %2046 = vmatmul.msk.bf16.vlgmr.msrb.gmra.mxu1 %vm1105_vm0, %v1072_v3  ;;  %v2254_v3 = vld [vmem:[#allocation14 + $0x10] sm:$0xff] }
 0x131   : > { %1334 = vmatpush.bf16.msrb.mxu3 %v2254_v3 }
 0x19d   : > { %v858_v5 = vpop.f32.mrf.mxu1 }
 0x19e   : > { %v859_v6 = vadd.f32 %v2427_v4, %v858_v5 }
 0x1a0   : > { %v862_v7 = vpack.c.bf16 %v859_v6, %v859_v6  ;;  %v2253_v6 = vld [vmem:[#allocation14 + $0x8] sm:$0xff] }
 0x1a1   : > { %1335 = vmatpush.bf16.msrb.mxu3 %v2253_v6 }
 0x1a2   : > { %1039 = vmatmul.bf16.vlgmr.msra.gmra.mxu2 %v862_v7  ;;  %1052 = vmatmul.bf16.vlgmr.msra.gmra.mxu3 %v862_v7 }
 0x1a3   : > { %1065 = vmatmul.bf16.vlgmr.msrb.gmra.mxu0 %v862_v7 }
 0x1a5   : > { %v860_v8 = vpop.f32.mrf.mxu1 }
 0x1ad   : > { %v1118_v9 = vpop.f32.mrf.mxu1 }
 0x1b5   : > { %v1120_v10 = vpop.f32.mrf.mxu1 }
 0x220   : > { %v3153_v15 = vpop.f32.mrf.mxu0 }
 0x225   : > { %v1040_v20 = vpop.f32.mrf.mxu2  ;;  %v1053_v21 = vpop.f32.mrf.mxu3 }
 0x226   : > { %v1041_v22 = vadd.f32 %v1040_v20, %v897_v17  ;;  %v1054_v1 = vadd.f32 %v1053_v21, %v898_v0 }
 0x228   : > { %v1119_v26 = vadd.f32 %v1118_v9, %v1041_v22  ;;  %v1068_v27 = vpop.f32.mrf.mxu0  ;;  %v2252_v9 = vld [vmem:[#allocation14] sm:$0xff] }
 0x229   : > { %1336 = vmatpush.bf16.msrb.mxu3 %v2252_v9 }
 0x22a   : > { %v1123_v29 = vmul.f32 0.70710677, %v1119_v26  ;;  %v1122_v56 = vmul.f32 0.5, %v1119_v26 }
 0x22c   : > { %v2047_v30 = vclamps-f32 %v1123_v29, 4.0 }
 0x22d   : > { %v1042_v32 = vpop.f32.mrf.mxu2  ;;  %v1055_v33 = vpop.f32.mrf.mxu3 }
 0x22e   : > { %v1126_v34 = vmul.f32 %v2047_v30, %v2047_v30 }
 0x230   : > { %v1127_v35 = vmul.f32 -2.7261424e-10, %v1126_v34  ;;  %v1140_v36 = vmul.f32 -1.45660715e-05, %v1126_v34 }
 0x232   : > { %v1128_v37 = vadd.f32 2.7706815e-08, %v1127_v35  ;;  %v1141_v38 = vadd.f32 -0.00021337405, %v1140_v36 }
 0x234   : > { %v1129_v39 = vmul.f32 %v1128_v37, %v1126_v34  ;;  %v1142_v40 = vmul.f32 %v1141_v38, %v1126_v34 }
 0x236   : > { %v1130_v41 = vadd.f32 -2.101024e-06, %v1129_v39  ;;  %v1143_v42 = vadd.f32 -0.001682827, %v1142_v40 }
 0x238   : > { %v1131_v43 = vmul.f32 %v1130_v41, %v1126_v34  ;;  %v1144_v44 = vmul.f32 %v1143_v42, %v1126_v34 }
 0x23a   : > { %v1132_v45 = vadd.f32 -5.6925062e-05, %v1131_v43  ;;  %v1145_v24 = vadd.f32 -0.0073733293, %v1144_v44  ;;  %v2267_v44 = vld [vmem:[#allocation13 + $0x78] sm:$0xff] }
 0x23b   : > { %1439 = vmatpush.bf16.msra.mxu1 %v2267_v44 }
 0x23c   : > { %v1133_v46 = vmul.f32 %v1132_v45, %v1126_v34  ;;  %v1146_v47 = vmul.f32 %v1145_v24, %v1126_v34  ;;  %v2266_v45 = vld [vmem:[#allocation13 + $0x70] sm:$0xff]  ;;  %v2265_v24 = vld [vmem:[#allocation13 + $0x68] sm:$0xff] }
 0x23e   : > { %v1134_v48 = vadd.f32 -0.00073499064, %v1133_v46  ;;  %v1147_v49 = vadd.f32 -0.014264739, %v1146_v47  ;;  %v2264_v46 = vld [vmem:[#allocation13 + $0x60] sm:$0xff] }
 0x23f   : > { %1440 = vmatpush.bf16.msra.mxu1 %v2266_v45  ;;  %v2428_v47 = vld [vmem:[#allocation16] ss:$0 sm:$0xff] }
 0x240   : > { %v1135_v50 = vmul.f32 %v1134_v48, %v1126_v34  ;;  %2434 = vrcp.f32 %v1147_v49  ;;  %v2263_v48 = vld [vmem:[#allocation13 + $0x58] sm:$0xff] }
 0x241   : > { %v2279_v45 = vld [vmem:[#allocation19 + $0x18] sm:$0xff] }
 0x242   : > { %v1136_v51 = vadd.f32 -0.0029546, %v1135_v50  ;;  %1651 = vmatpush.bf16.msra.mxu2 %v2279_v45 }
 0x243   : > { %1441 = vmatpush.bf16.msra.mxu1 %v2265_v24 }
 0x244   : > { %v1137_v52 = vmul.f32 %v1136_v51, %v1126_v34  ;;  %v2262_v51 = vld [vmem:[#allocation13 + $0x50] sm:$0xff] }
 0x246   : > { %v1138_v53 = vadd.f32 -0.016096033, %v1137_v52  ;;  %v2435_v55 = vpop.eup %2434 }
 0x247   : > { %1442 = vmatpush.bf16.msra.mxu1 %v2264_v46 }
 0x248   : > { %v1139_v54 = vmul.f32 %v2047_v30, %v1138_v53 }
 0x24a   : > { %v1149_v23 = vmul.f32 %v2435_v55, %v1139_v54  ;;  %v2261_v54 = vld [vmem:[#allocation13 + $0x48] sm:$0xff] }
 0x24b   : > { %1443 = vmatpush.bf16.msra.mxu1 %v2263_v48 }
 0x24c   : > { %v1150_v57 = vadd.f32 1.0, %v1149_v23 }
 0x24e   : > { %v3158_v58 = vmul.f32 %v1150_v57, %v1122_v56 }
 0x24f   : > { %1444 = vmatpush.bf16.msra.mxu1 %v2262_v51 }
 0x250   : > { %v1152_v59 = vpack.c.bf16 %v3158_v58, %v3158_v58 }
 0x252   : > { %1225 = vmatmul.bf16.vlgmr.msrb.gmra.mxu2 %v1152_v59  ;;  %v2260_v59 = vld [vmem:[#allocation13 + $0x40] sm:$0xff] }
 0x253   : > { %1445 = vmatpush.bf16.msra.mxu1 %v2261_v54 }
 0x257   : > { %1446 = vmatpush.bf16.msra.mxu1 %v2260_v59 }
 0x2d5   : > { %v1226_v4 = vpop.f32.mrf.mxu2 }
 0x2d6   : > { %v1227_v5 = vadd.f32 %v1226_v4, %v1054_v1 }
 0x2d8   : > { %v1231_v7 = vmul.f32 0.70710677, %v1227_v5  ;;  %v1230_v40 = vmul.f32 0.5, %v1227_v5 }
 0x2da   : > { %v2080_v8 = vclamps-f32 %v1231_v7, 4.0 }
 0x2dc   : > { %v1234_v10 = vmul.f32 %v2080_v8, %v2080_v8 }
 0x2dd   : > { %v1228_v11 = vpop.f32.mrf.mxu2 }
 0x2de   : > { %v1235_v12 = vmul.f32 -2.7261424e-10, %v1234_v10  ;;  %v1248_v13 = vmul.f32 -1.45660715e-05, %v1234_v10 }
 0x2e0   : > { %v1236_v14 = vadd.f32 2.7706815e-08, %v1235_v12  ;;  %v1249_v17 = vadd.f32 -0.00021337405, %v1248_v13 }
 0x2e2   : > { %v1237_v18 = vmul.f32 %v1236_v14, %v1234_v10  ;;  %v1250_v20 = vmul.f32 %v1249_v17, %v1234_v10 }
 0x2e4   : > { %v1238_v22 = vadd.f32 -2.101024e-06, %v1237_v18  ;;  %v1251_v21 = vadd.f32 -0.001682827, %v1250_v20 }
 0x2e6   : > { %v1239_v25 = vmul.f32 %v1238_v22, %v1234_v10  ;;  %v1252_v26 = vmul.f32 %v1251_v21, %v1234_v10 }
 0x2e8   : > { %v1240_v27 = vadd.f32 -5.6925062e-05, %v1239_v25  ;;  %v1253_v28 = vadd.f32 -0.0073733293, %v1252_v26 }
 0x2ea   : > { %v1241_v29 = vmul.f32 %v1240_v27, %v1234_v10  ;;  %v1254_v30 = vmul.f32 %v1253_v28, %v1234_v10  ;;  %v2275_v27 = vld [vmem:[#allocation14 + $0x78] sm:$0xff]  ;;  %v2274_v28 = vld [vmem:[#allocation14 + $0x70] sm:$0xff] }
 0x2eb   : > { %1553 = vmatpush.bf16.msra.mxu0 %v2275_v27 }
 0x2ec   : > { %v1242_v31 = vadd.f32 -0.00073499064, %v1241_v29  ;;  %v1255_v32 = vadd.f32 -0.014264739, %v1254_v30  ;;  %v2273_v29 = vld [vmem:[#allocation14 + $0x68] sm:$0xff]  ;;  %v2272_v30 = vld [vmem:[#allocation14 + $0x60] sm:$0xff] }
 0x2ee   : > { %v1243_v33 = vmul.f32 %v1242_v31, %v1234_v10  ;;  %2436 = vrcp.f32 %v1255_v32  ;;  %v899_v31 = vperm.slane %v3155_v16, 2  ;;  %v2271_v32 = vld [vmem:[#allocation14 + $0x58] sm:$0xff] }
 0x2ef   : > { %1554 = vmatpush.bf16.msra.mxu0 %v2274_v28 }
 0x2f0   : > { %v1244_v34 = vadd.f32 -0.0029546, %v1243_v33  ;;  %v1067_v33 = vadd.f32 %v3153_v15, %v899_v31  ;;  %v2278_v15 = vld [vmem:[#allocation19 + $0x10] sm:$0xff] }
 0x2f1   : > { %1652 = vmatpush.bf16.msra.mxu2 %v2278_v15 }
 0x2f2   : > { %v1245_v35 = vmul.f32 %v1244_v34, %v1234_v10 }
 0x2f3   : > { %1555 = vmatpush.bf16.msra.mxu0 %v2273_v29 }
 0x2f4   : > { %v1246_v36 = vadd.f32 -0.016096033, %v1245_v35  ;;  %v2437_v38 = vpop.eup %2436 }
 0x2f6   : > { %v1247_v37 = vmul.f32 %v2080_v8, %v1246_v36 }
 0x2f7   : > { %1556 = vmatpush.bf16.msra.mxu0 %v2272_v30 }
 0x2f8   : > { %v1257_v39 = vmul.f32 %v2437_v38, %v1247_v37  ;;  %v2269_v37 = vld [vmem:[#allocation14 + $0x48] sm:$0xff] }
 0x2fa   : > { %v1258_v41 = vadd.f32 1.0, %v1257_v39 }
 0x2fb   : > { %1557 = vmatpush.bf16.msra.mxu0 %v2271_v32 }
 0x2fc   : > { %v1259_v42 = vmul.f32 %v1258_v41, %v1230_v40  ;;  %v2268_v40 = vld [vmem:[#allocation14 + $0x40] sm:$0xff] }
 0x2fe   : > { %v1260_v43 = vpack.c.bf16 %v1259_v42, %v1259_v42 }
 0x300   : > { %1337 = vmatmul.bf16.vlgmr.msrb.gmra.mxu3 %v1260_v43 }
 0x383   : > { %v1338_v49 = vpop.f32.mrf.mxu3 }
 0x384   : > { %v1339_v50 = vadd.f32 %v2428_v47, %v1338_v49  ;;  %v1609_v49 = vmul.f32 2.0, %v3148_v2 }
 0x386   : > { %v1343_v52 = vmul.f32 0.70710677, %v1339_v50  ;;  %v1342_v20 = vmul.f32 0.5, %v1339_v50 }
 0x388   : > { %v2113_v53 = vclamps-f32 %v1343_v52, 4.0  ;;  %v2277_v52 = vld [vmem:[#allocation19 + $0x8] sm:$0xff] }
 0x389   : > { %1653 = vmatpush.bf16.msra.mxu2 %v2277_v52 }
 0x38a   : > { %v1346_v55 = vmul.f32 %v2113_v53, %v2113_v53 }
 0x38b   : > { %v1340_v23 = vpop.f32.mrf.mxu3 }
 0x38c   : > { %v1347_v56 = vmul.f32 -2.7261424e-10, %v1346_v55  ;;  %v1360_v57 = vmul.f32 -1.45660715e-05, %v1346_v55 }
 0x38e   : > { %v1348_v60 = vadd.f32 2.7706815e-08, %v1347_v56  ;;  %v1361_v61 = vadd.f32 -0.00021337405, %v1360_v57  ;;  %v2276_v57 = vld [vmem:[#allocation19] sm:$0xff] }
 0x38f   : > { %1654 = vmatpush.bf16.msra.mxu2 %v2276_v57 }
 0x390   : > { %v1349_v62 = vmul.f32 %v1348_v60, %v1346_v55  ;;  %v1362_v63 = vmul.f32 %v1361_v61, %v1346_v55 }
 0x392   : > { %v1350_v0 = vadd.f32 -2.101024e-06, %v1349_v62  ;;  %v1363_v19 = vadd.f32 -0.001682827, %v1362_v63 }
 0x394   : > { %v1351_v1 = vmul.f32 %v1350_v0, %v1346_v55  ;;  %v1364_v3 = vmul.f32 %v1363_v19, %v1346_v55 }
 0x396   : > { %v1352_v4 = vadd.f32 -5.6925062e-05, %v1351_v1  ;;  %v1365_v5 = vadd.f32 -0.0073733293, %v1364_v3 }
 0x398   : > { %v1353_v6 = vmul.f32 %v1352_v4, %v1346_v55  ;;  %v1366_v7 = vmul.f32 %v1365_v5, %v1346_v55 }
 0x39a   : > { %v1354_v8 = vadd.f32 -0.00073499064, %v1353_v6  ;;  %v1367_v9 = vadd.f32 -0.014264739, %v1366_v7 }
 0x39c   : > { %v1355_v10 = vmul.f32 %v1354_v8, %v1346_v55  ;;  %2438 = vrcp.f32 %v1367_v9  ;;  %v2429_v8 = vld [vmem:[#allocation16 + $0x1] ss:$0 sm:$0xff] }
 0x39e   : > { %v1356_v11 = vadd.f32 -0.0029546, %v1355_v10 }
 0x3a0   : > { %v1357_v12 = vmul.f32 %v1356_v11, %v1346_v55  ;;  %v3171_v55 = vadd.f32 -1.0, %v1609_v49 }
 0x3a2   : > { %v1358_v13 = vadd.f32 -0.016096033, %v1357_v12  ;;  %v2439_v17 = vpop.eup %2438  ;;  %v1611_v61 = vpack.c.bf16 %v3171_v55, %v3171_v55 }
 0x3a4   : > { %v1359_v14 = vmul.f32 %v2113_v53, %v1358_v13  ;;  %2197 = vmatmul.msk.bf16.vlgmr.msra.gmra.mxu2 %vm1105_vm0, %v1611_v61 }
 0x3a6   : > { %v1369_v18 = vmul.f32 %v2439_v17, %v1359_v14 }
 0x3a8   : > { %v1370_v22 = vadd.f32 1.0, %v1369_v18 }
 0x3aa   : > { %v1371_v21 = vmul.f32 %v1370_v22, %v1342_v20 }
 0x3ac   : > { %v3164_v25 = vadd.f32 %v1371_v21, %v3158_v58  ;;  %v2270_v58 = vld [vmem:[#allocation14 + $0x50] sm:$0xff] }
 0x3ad   : > { %1558 = vmatpush.bf16.msra.mxu0 %v2270_v58 }
 0x3ae   : > { %v1373_v26 = vpack.c.bf16 %v3164_v25, %v3164_v25 }
 0x3b0   : > { %1447 = vmatmul.bf16.vlgmr.msra.gmra.mxu1 %v1373_v26 }
 0x3b1   : > { %1559 = vmatpush.bf16.msra.mxu0 %v2269_v37 }
 0x3b5   : > { %1560 = vmatpush.bf16.msra.mxu0 %v2268_v40 }
 0x427   : > { %v1656_v11 = vpop.f32.mrf.mxu2 }
 0x42d   : > { %v1448_v34 = vpop.f32.mrf.mxu1 }
 0x42e   : > { %v1449_v35 = vadd.f32 %v1448_v34, %v1067_v33 }
 0x42f   : > { %v1658_v22 = vpop.f32.mrf.mxu2 }
 0x430   : > { %v1453_v36 = vmul.f32 0.70710677, %v1449_v35  ;;  %v1452_v4 = vmul.f32 0.5, %v1449_v35 }
 0x432   : > { %v2146_v38 = vclamps-f32 %v1453_v36, 4.0 }
 0x434   : > { %v1456_v39 = vmul.f32 %v2146_v38, %v2146_v38 }
 0x435   : > { %v1450_v41 = vpop.f32.mrf.mxu1 }
 0x436   : > { %v1457_v42 = vmul.f32 -2.7261424e-10, %v1456_v39  ;;  %v1470_v43 = vmul.f32 -1.45660715e-05, %v1456_v39 }
 0x438   : > { %v1458_v44 = vadd.f32 2.7706815e-08, %v1457_v42  ;;  %v1471_v16 = vadd.f32 -0.00021337405, %v1470_v43 }
 0x43a   : > { %v1459_v24 = vmul.f32 %v1458_v44, %v1456_v39  ;;  %v1472_v46 = vmul.f32 %v1471_v16, %v1456_v39 }
 0x43c   : > { %v1460_v47 = vadd.f32 -2.101024e-06, %v1459_v24  ;;  %v1473_v48 = vadd.f32 -0.001682827, %v1472_v46  ;;  %v2430_v46 = vld [vmem:[#allocation17] ss:$0 sm:$0xff] }
 0x43e   : > { %v1461_v50 = vmul.f32 %v1460_v47, %v1456_v39  ;;  %v1474_v51 = vmul.f32 %v1473_v48, %v1456_v39  ;;  %v1660_v48 = vmul.f32 %v3171_v55, %v1656_v11 }
 0x440   : > { %v1462_v53 = vadd.f32 -5.6925062e-05, %v1461_v50  ;;  %v1475_v54 = vadd.f32 -0.0073733293, %v1474_v51  ;;  %v1661_v49 = vsel %vm1105_vm0, %v1660_v48, 0.0 }
 0x441   : > { %v2431_v51 = vld [vmem:[#allocation2] ss:$0 sm:$0xff] }
 0x442   : > { %v1463_v23 = vmul.f32 %v1462_v53, %v1456_v39  ;;  %v1476_v56 = vmul.f32 %v1475_v54, %v1456_v39 }
 0x444   : > { %v1464_v59 = vadd.f32 -0.00073499064, %v1463_v23  ;;  %v1477_v60 = vadd.f32 -0.014264739, %v1476_v56 }
 0x446   : > { %v1465_v62 = vmul.f32 %v1464_v59, %v1456_v39  ;;  %2440 = vrcp.f32 %v1477_v60 }
 0x448   : > { %v1466_v2 = vadd.f32 -0.0029546, %v1465_v62 }
 0x44a   : > { %v1467_v63 = vmul.f32 %v1466_v2, %v1456_v39 }
 0x44c   : > { %v1468_v0 = vadd.f32 -0.016096033, %v1467_v63  ;;  %v2441_v1 = vpop.eup %2440 }
 0x44e   : > { %v1469_v19 = vmul.f32 %v2146_v38, %v1468_v0 }
 0x450   : > { %v1479_v3 = vmul.f32 %v2441_v1, %v1469_v19 }
 0x452   : > { %v1480_v5 = vadd.f32 1.0, %v1479_v3 }
 0x454   : > { %v1481_v6 = vmul.f32 %v1480_v5, %v1452_v4 }
 0x456   : > { %v1482_v7 = vpack.c.bf16 %v1481_v6, %v1481_v6 }
 0x458   : > { %1561 = vmatmul.bf16.vlgmr.msra.gmra.mxu0 %v1482_v7 }
 0x4d5   : > { %v1562_v9 = vpop.f32.mrf.mxu0 }
 0x4d6   : > { %v1563_v10 = vadd.f32 %v2429_v8, %v1562_v9 }
 0x4d8   : > { %v1567_v12 = vmul.f32 0.70710677, %v1563_v10  ;;  %v1566_v16 = vmul.f32 0.5, %v1563_v10 }
 0x4da   : > { %v2179_v13 = vclamps-f32 %v1567_v12, 4.0 }
 0x4dc   : > { %v1570_v14 = vmul.f32 %v2179_v13, %v2179_v13 }
 0x4dd   : > { %v1564_v17 = vpop.f32.mrf.mxu0 }
 0x4de   : > { %v1571_v18 = vmul.f32 -2.7261424e-10, %v1570_v14  ;;  %v1584_v20 = vmul.f32 -1.45660715e-05, %v1570_v14 }
 0x4e0   : > { %v1572_v21 = vadd.f32 2.7706815e-08, %v1571_v18  ;;  %v1585_v26 = vadd.f32 -0.00021337405, %v1584_v20 }
 0x4e2   : > { %v1573_v27 = vmul.f32 %v1572_v21, %v1570_v14  ;;  %v1586_v28 = vmul.f32 %v1585_v26, %v1570_v14 }
 0x4e4   : > { %v1574_v29 = vadd.f32 -2.101024e-06, %v1573_v27  ;;  %v1587_v30 = vadd.f32 -0.001682827, %v1586_v28 }
 0x4e6   : > { %v1575_v31 = vmul.f32 %v1574_v29, %v1570_v14  ;;  %v1588_v32 = vmul.f32 %v1587_v30, %v1570_v14 }
 0x4e8   : > { %v1576_v33 = vadd.f32 -5.6925062e-05, %v1575_v31  ;;  %v1589_v58 = vadd.f32 -0.0073733293, %v1588_v32 }
 0x4ea   : > { %v1577_v34 = vmul.f32 %v1576_v33, %v1570_v14  ;;  %v1590_v35 = vmul.f32 %v1589_v58, %v1570_v14 }
 0x4ec   : > { %v1578_v36 = vadd.f32 -0.00073499064, %v1577_v34  ;;  %v1591_v37 = vadd.f32 -0.014264739, %v1590_v35 }
 0x4ee   : > { %v1579_v38 = vmul.f32 %v1578_v36, %v1570_v14  ;;  %2442 = vrcp.f32 %v1591_v37 }
 0x4f0   : > { %v1580_v39 = vadd.f32 -0.0029546, %v1579_v38 }
 0x4f2   : > { %v1581_v40 = vmul.f32 %v1580_v39, %v1570_v14 }
 0x4f4   : > { %v1582_v41 = vadd.f32 -0.016096033, %v1581_v40  ;;  %v2443_v43 = vpop.eup %2442 }
 0x4f6   : > { %v1583_v42 = vmul.f32 %v2179_v13, %v1582_v41 }
 0x4f8   : > { %v1593_v44 = vmul.f32 %v2443_v43, %v1583_v42 }
 0x4fa   : > { %v1594_v45 = vadd.f32 1.0, %v1593_v44 }
 0x4fc   : > { %v1595_v24 = vmul.f32 %v1594_v45, %v1566_v16 }
 0x4fe   : > { %v1596_v15 = vadd.f32 %v1595_v24, %v3164_v25 }
 0x500   : > { %v1601_v47 = vmul.f32 %v2430_v46, %v1596_v15 }
 0x502   : > { %1602 = vadd.xlane.f32.xlu0 %v1601_v47 }
 0x50a   : > { %1662 = vadd.xlane.f32.xlu0 %v1661_v49 }
 0x575   : > { %v1603_v50 = vpop.xlane.xlu0 %1602 }
 0x576   : > { %v1608_v53 = vadd.f32 %v2431_v51, %v1603_v50 }
 0x57d   : > { %v1663_v52 = vpop.xlane.xlu0 %1662 }
 0x57e   : > { %v1664_v54 = vsub.f32 0.0, %v1663_v52 }
 0x580   : > { %v1665_v23 = vsub.f32 %v1608_v53, %v1664_v54 }
 0x582   : > { %1667 = vst.msk [vmem:[%s664_s19] sm:$0xff] %vm1666_vm1, %v1665_v23 }
 0x583 PF: > { %p31_p1 = scmp.ge.s32.totalorder %s3034_s29, 4   ;;  %s3239_s15 = smov %s2820_s16 }
 0x584   : > { %s3240_s16 = smov %s2824_s17  ;;  %s3241_s17 = smov %s3045_s27 }
 0x585   : > { %s3242_s18 = smov %s3034_s29  ;;  %33 = sbr.rel (!%p31_p1) target bundleno = 15 (0xf), region = 163 }
 0x58a   :  { %1687 = vsyncpa [#allocation4], 1 }
 0x58b   :  { %1689 = vsyncpa [#allocation4 + $0x1], 1 }
 0x58c   :  { %1690 = vsyncpa [#allocation6], 1 }
 0x58d   :  { %1691 = vsyncpa [#allocation9], 1 }
 0x58e   :  { %1692 = vsyncpa [#allocation12], 1 }
 0x58f   :  { %1693 = vsyncpa [#allocation15], 1 }
 0x590   :  { %1694 = vsyncpa [#allocation18], 1 }

</bundles_post_ra>
